<compile_context>
chip_gen: v5e
topology: v5e:2x2
jax: 0.10.0
libtpu: 0.0.40
codegen_flags: <defaults>
</compile_context>

<pallas_src>
import functools

import jax
import jax.numpy as jnp
import numpy as np
from jax.experimental import pallas as pl
from jax.experimental.pallas import tpu as pltpu


def _stblock_kernel(*refs, dropout_p, matmul_dtype):
    """Fused STBlock forward for one batch block.

    refs = (x_ref[, u_ref], pcat_ref, wcat_ref, bias_ref, out_ref)
      x_ref   : [V, Nb*L, C]     input slab (node dim leading)
      u_ref   : [V, Nb*L, C]     uniform(0,1) randoms (only when dropout_p > 0)
      pcat_ref: [V, 2V]          [P | P^T]   (precomputed Euler propagator)
      wcat_ref: [C, 2*Cout]      [W1 | W2]   (fused 1x1 convs)
      bias_ref: [1, Nb*L*Cout]   (b1 + b2) tiled over (n, l)
      out_ref : [V, Nb*L*Cout]   lane-dense output block
    """
    if dropout_p > 0.0:
        x_ref, u_ref, pcat_ref, wcat_ref, bias_ref, out_ref = refs
    else:
        x_ref, pcat_ref, wcat_ref, bias_ref, out_ref = refs
        u_ref = None

    V, nbl, C = x_ref.shape
    cout2 = wcat_ref.shape[1]
    cout = cout2 // 2

    # [V, Nb*L, C] -> [V*Nb*L, C]: leading-dim merge, last dim unchanged (free).
    x = x_ref[...].reshape(V * nbl, C).astype(jnp.float32)

    # --- dropout (F.dropout with training=True), elementwise in fp32 ---
    if dropout_p > 0.0:
        u = u_ref[...].reshape(V * nbl, C)
        scale = jnp.float32(1.0 / (1.0 - dropout_p))
        x = jnp.where(u >= jnp.float32(dropout_p), x * scale, jnp.float32(0.0))

    # --- fused 1x1 convs for both directions: [V*Nb*L, C] @ [C, 2*Cout] ---
    g = jnp.dot(x.astype(matmul_dtype), wcat_ref[...].astype(matmul_dtype),
                preferred_element_type=jnp.float32)
    g = g.reshape(V, nbl, cout2)

    # Stack the two direction states along the node axis -> [2V, Nb*L*Cout].
    gstack = jnp.concatenate(
        [g[:, :, :cout].reshape(V, nbl * cout),
         g[:, :, cout:].reshape(V, nbl * cout)], axis=0)

    # --- fused graph propagation for both directions:
    #     [P | P^T] ([V, 2V]) @ [2V, Nb*L*Cout]  ->  [V, Nb*L*Cout]
    y = jnp.dot(pcat_ref[...].astype(matmul_dtype), gstack.astype(matmul_dtype),
                preferred_element_type=jnp.float32)
    y = y + bias_ref[...]

    out_ref[...] = y.astype(out_ref.dtype)   # lane-dense (multiple-of-128) store


def _euler_propagator(adj, alpha, time, step_size):
    """P = (I + 0.5*alpha*step_size*(A - I))^K with K = time/step_size."""
    num_steps = int(round(time / step_size))
    coef = 0.5 * float(alpha) * float(step_size)
    V = adj.shape[0]
    eye = jnp.eye(V, dtype=jnp.float32)
    M = eye + jnp.float32(coef) * (adj.astype(jnp.float32) - eye)
    P = eye
    for _ in range(num_steps):
        P = M @ P
    return P


def stblock_forward(x_nchw, adj, params, *, alpha, time, step_size, dropout_p,
                    rng_key=None, batch_block=None, matmul_dtype=jnp.float32):
    """x_nchw: [N, C, V, L] (PyTorch NCHW). Returns [N, Cout, V, L]."""
    N, C, V, L = x_nchw.shape
    w1, b1, w2, b2 = params["w1"], params["b1"], params["w2"], params["b2"]
    Cout = w1.shape[1]

    # ---------------- wrapper-side algebraic precomputation ----------------
    P = _euler_propagator(adj, alpha, time, step_size)           # [V, V]
    pcat = jnp.concatenate([P, P.T], axis=1)                     # [V, 2V]
    wcat = jnp.concatenate([w1, w2], axis=1)                     # [C, 2*Cout]
    bsum = (b1 + b2).reshape(1, Cout).astype(jnp.float32)        # [1, Cout]
    if matmul_dtype != jnp.float32:
        pcat = pcat.astype(matmul_dtype)
        wcat = wcat.astype(matmul_dtype)

    # ---------------- batch-block size (fold batch into matmul columns) ----
    has_rand = dropout_p > 0.0
    if batch_block is None:
        # Conservative VMEM budget (double-buffered x, rand, out blocks);
        # sized so it also fits v7x's smaller (64 MiB physical) VMEM.
        per_sample = V * L * ((2 if has_rand else 1) * C + Cout) * 4 * 2
        budget = 8 << 20
        batch_block = int(max(1, min(N, budget // max(per_sample, 1))))
    n_blocks = -(-N // batch_block)
    N_pad = n_blocks * batch_block

    # ---------------- layout: NCHW -> [V, N, L, C] -> [V, N*L, C] ----------
    xv = jnp.transpose(x_nchw, (2, 0, 3, 1))                     # [V, N, L, C]
    if N_pad != N:
        xv = jnp.pad(xv, ((0, 0), (0, N_pad - N), (0, 0), (0, 0)))
    xv = xv.reshape(V, N_pad * L, C)

    nbl = batch_block * L
    bias_tiled = jnp.tile(bsum, (1, nbl))                        # [1, Nb*L*Cout]

    in_specs = [pl.BlockSpec((V, nbl, C), lambda n: (0, n, 0))]
    args = [xv]
    if has_rand:
        if rng_key is None:
            rng_key = jax.random.PRNGKey(0)
        u = jax.random.uniform(rng_key, (V, N_pad * L, C), jnp.float32)
        in_specs.append(pl.BlockSpec((V, nbl, C), lambda n: (0, n, 0)))
        args.append(u)
    in_specs += [
        pl.BlockSpec((V, 2 * V), lambda n: (0, 0)),              # [P | P^T]
        pl.BlockSpec((C, 2 * Cout), lambda n: (0, 0)),           # [W1 | W2]
        pl.BlockSpec((1, nbl * Cout), lambda n: (0, 0)),         # tiled bias
    ]
    args += [pcat, wcat, bias_tiled]

    kernel = functools.partial(_stblock_kernel, dropout_p=float(dropout_p),
                               matmul_dtype=matmul_dtype)

    out = pl.pallas_call(
        kernel,
        out_shape=jax.ShapeDtypeStruct((V, N_pad * L * Cout), x_nchw.dtype),
        grid=(n_blocks,),
        in_specs=in_specs,
        out_specs=pl.BlockSpec((V, nbl * Cout), lambda n: (0, n)),
        compiler_params=pltpu.CompilerParams(
            dimension_semantics=("parallel",),       # batch blocks are independent
            vmem_limit_bytes=32 * 1024 * 1024),
    )(*args)

    out = out.reshape(V, N_pad, L, Cout)[:, :N]                  # [V, N, L, Cout]
    return jnp.transpose(out, (1, 3, 0, 2))                      # [N, Cout, V, L]


def _reference_no_dropout(x_nchw, adj, params, *, alpha, time, step_size):
    """Pure-JAX reference of STBlock with dropout disabled (for verification)."""
    num_steps = int(round(time / step_size))
    coef = 0.5 * alpha * step_size

    def prop(h, A):
        for _ in range(num_steps):
            ah = jnp.einsum('vw,ncwl->ncvl', A, h)   # == einsum('ncwl,vw->ncvl', h, A)
            h = h + coef * (ah - h)
        return h

    h1 = prop(x_nchw, adj)
    h2 = prop(x_nchw, adj.T)
    w1, b1, w2, b2 = params["w1"], params["b1"], params["w2"], params["b2"]
    y1 = jnp.einsum('ncvl,co->novl', h1, w1) + b1.reshape(1, -1, 1, 1)
    y2 = jnp.einsum('ncvl,co->novl', h2, w2) + b2.reshape(1, -1, 1, 1)
    return y1 + y2


def _init_params(key, c_in, c_out):
    """Deterministic Conv2d(kernel=1x1)-style init; weights stored as [Cin, Cout]."""
    k1, k2, k3, k4 = jax.random.split(key, 4)
    bound = 1.0 / np.sqrt(c_in)
    w1 = jax.random.uniform(k1, (c_in, c_out), jnp.float32, -bound, bound)
    b1 = jax.random.uniform(k2, (1, c_out), jnp.float32, -bound, bound)
    w2 = jax.random.uniform(k3, (c_in, c_out), jnp.float32, -bound, bound)
    b2 = jax.random.uniform(k4, (1, c_out), jnp.float32, -bound, bound)
    return {"w1": w1, "b1": b1, "w2": w2, "b2": b2}


if __name__ == "__main__":
    # Small shapes consistent with the module: batch=2, hidden_channels=32,
    # num_nodes=8, seq_len=16.
    N, C, V, L = 2, 32, 8, 16
    alpha, time, step_size, dropout_p = 2.0, 1.0, 0.25, 0.3

    key = jax.random.PRNGKey(0)
    kx, kg, kp, kd = jax.random.split(key, 4)

    x = jax.random.normal(kx, (N, C, V, L), jnp.float32)
    # Row-normalized random non-negative adjacency (stands in for set_graph()).
    raw = jnp.abs(jax.random.normal(kg, (V, V), jnp.float32))
    adj = raw / jnp.sum(raw, axis=1, keepdims=True)
    params = _init_params(kp, C, C)

    # Correctness check with dropout disabled (deterministic path, fp32 matmuls).
    out_nodrop = stblock_forward(x, adj, params, alpha=alpha, time=time,
                                 step_size=step_size, dropout_p=0.0)
    ref = _reference_no_dropout(x, adj, params, alpha=alpha, time=time,
                                step_size=step_size)
    np.testing.assert_allclose(np.asarray(out_nodrop), np.asarray(ref),
                               rtol=1e-4, atol=1e-4)

    # Full forward with dropout active (as in the module, p=0.3); exercise the
    # bf16-operand / fp32-accumulate matmul path recommended for v6e/v7x.
    out = stblock_forward(x, adj, params, alpha=alpha, time=time,
                          step_size=step_size, dropout_p=dropout_p,
                          rng_key=kd, matmul_dtype=jnp.bfloat16)
    jax.block_until_ready(out)
    assert out.shape == (N, C, V, L)
    assert bool(jnp.all(jnp.isfinite(out)))
    print("KERNEL_OK")
</pallas_src>

<mosaic_0001>
module attributes {stable_mosaic.version = 11 : i64} {
  func.func @_stblock_kernel(%arg0: i32, %arg1: memref<8x32x32xf32, #tpu.memory_space<vmem>>, %arg2: memref<8x16xf32, #tpu.memory_space<vmem>>, %arg3: memref<32x64xf32, #tpu.memory_space<vmem>>, %arg4: memref<1x1024xf32, #tpu.memory_space<vmem>>, %arg5: memref<8x1024xf32, #tpu.memory_space<vmem>>) attributes {dimension_semantics = [#tpu.dimension_semantics<parallel>], iteration_bounds = array<i64: 1>, scalar_prefetch = 0 : i64, scratch_operands = 0 : i64, tpu.core_type = #tpu.core_type<tc>, window_params = [{transform_indices = @transform_0, window_bounds = array<i64: 8, 32, 32>}, {pipeline_mode = #tpu.pipeline_mode<synchronous>, transform_indices = @transform_1, window_bounds = array<i64: 8, 16>}, {pipeline_mode = #tpu.pipeline_mode<synchronous>, transform_indices = @transform_2, window_bounds = array<i64: 32, 64>}, {pipeline_mode = #tpu.pipeline_mode<synchronous>, transform_indices = @transform_3, window_bounds = array<i64: 1, 1024>}, {transform_indices = @transform_4, window_bounds = array<i64: 8, 1024>}]} {
    %c0 = arith.constant 0 : index
    %c0_0 = arith.constant 0 : index
    %c0_1 = arith.constant 0 : index
    %0 = vector.load %arg1[%c0, %c0_0, %c0_1] : memref<8x32x32xf32, #tpu.memory_space<vmem>>, vector<8x32x32xf32>
    %1 = vector.shape_cast %0 : vector<8x32x32xf32> to vector<256x32xf32>
    %c0_2 = arith.constant 0 : index
    %c0_3 = arith.constant 0 : index
    %2 = vector.load %arg3[%c0_2, %c0_3] : memref<32x64xf32, #tpu.memory_space<vmem>>, vector<32x64xf32>
    %cst = arith.constant dense<0.000000e+00> : vector<256x64xf32>
    %3 = tpu.matmul %1, %2, %cst {dimension_numbers = #tpu.dot_dimension_numbers<[1], [0], [0], [1], [0, 0, 1, 1], [], []>} : vector<256x32xf32>, vector<32x64xf32>, vector<256x64xf32> -> vector<256x64xf32>
    %4 = vector.shape_cast %3 : vector<256x64xf32> to vector<8x32x64xf32>
    %5 = vector.extract_strided_slice %4 {offsets = [0, 0, 0], sizes = [8, 32, 32], strides = [1, 1, 1]} : vector<8x32x64xf32> to vector<8x32x32xf32>
    %6 = vector.shape_cast %5 : vector<8x32x32xf32> to vector<8x1024xf32>
    %7 = vector.extract_strided_slice %4 {offsets = [0, 0, 32], sizes = [8, 32, 32], strides = [1, 1, 1]} : vector<8x32x64xf32> to vector<8x32x32xf32>
    %8 = vector.shape_cast %7 : vector<8x32x32xf32> to vector<8x1024xf32>
    %9 = tpu.concatenate %6, %8 in 0 : vector<8x1024xf32>, vector<8x1024xf32> -> vector<16x1024xf32>
    %c0_4 = arith.constant 0 : index
    %c0_5 = arith.constant 0 : index
    %10 = vector.load %arg2[%c0_4, %c0_5] : memref<8x16xf32, #tpu.memory_space<vmem>>, vector<8x16xf32>
    %cst_6 = arith.constant dense<0.000000e+00> : vector<8x1024xf32>
    %11 = tpu.matmul %10, %9, %cst_6 {dimension_numbers = #tpu.dot_dimension_numbers<[1], [0], [0], [1], [0, 0, 1, 1], [], []>} : vector<8x16xf32>, vector<16x1024xf32>, vector<8x1024xf32> -> vector<8x1024xf32>
    %c0_7 = arith.constant 0 : index
    %c0_8 = arith.constant 0 : index
    %12 = vector.load %arg4[%c0_7, %c0_8] : memref<1x1024xf32, #tpu.memory_space<vmem>>, vector<1x1024xf32>
    %13 = vector.broadcast %12 : vector<1x1024xf32> to vector<8x1024xf32>
    %14 = arith.addf %11, %13 : vector<8x1024xf32>
    %c0_9 = arith.constant 0 : index
    %c0_10 = arith.constant 0 : index
    %15 = vector.load %arg5[%c0_9, %c0_10] : memref<8x1024xf32, #tpu.memory_space<vmem>>, vector<8x1024xf32>
    tpu.vector_store %arg5[%c0_9, %c0_10], %14 {strides = array<i32>} : memref<8x1024xf32, #tpu.memory_space<vmem>>, vector<8x1024xf32>,
    return
  }
  func.func @transform_0(%arg0: i32) -> (i32, i32, i32) {
    %c0_i32 = arith.constant 0 : i32
    %c0_i32_0 = arith.constant 0 : i32
    %c0_i32_1 = arith.constant 0 : i32
    return %c0_i32, %arg0, %c0_i32_0 : i32, i32, i32
  }
  func.func @transform_1(%arg0: i32) -> (i32, i32) {
    %c0_i32 = arith.constant 0 : i32
    %c0_i32_0 = arith.constant 0 : i32
    %c0_i32_1 = arith.constant 0 : i32
    return %c0_i32, %c0_i32_0 : i32, i32
  }
  func.func @transform_2(%arg0: i32) -> (i32, i32) {
    %c0_i32 = arith.constant 0 : i32
    %c0_i32_0 = arith.constant 0 : i32
    %c0_i32_1 = arith.constant 0 : i32
    return %c0_i32, %c0_i32_0 : i32, i32
  }
  func.func @transform_3(%arg0: i32) -> (i32, i32) {
    %c0_i32 = arith.constant 0 : i32
    %c0_i32_0 = arith.constant 0 : i32
    %c0_i32_1 = arith.constant 0 : i32
    return %c0_i32, %c0_i32_0 : i32, i32
  }
  func.func @transform_4(%arg0: i32) -> (i32, i32) {
    %c0_i32 = arith.constant 0 : i32
    %c0_i32_0 = arith.constant 0 : i32
    return %c0_i32, %arg0 : i32, i32
  }
}

</mosaic_0001>

<bundles_post_ra>
// kernel: tpu_custom_call.1
= control target key start
LH: loop header
LB: loop body
LE: loop exit
PB: predicated region body
PF: predicated region fallthrough
CT: control target
= control target key end

     0   :  { %9 = vsyncpa [#allocation3], 0  ;;  %s3425_s0 = inlined_call_operand.hbm [shape: f32[8,32,32], index: 0, kind: input, shape index: {}]   ;;  %s3426_s1 = inlined_call_operand.hbm [shape: f32[8,16], index: 1, kind: input, shape index: {}]   ;;  %s3427_s2 = inlined_call_operand.hbm [shape: f32[32,64], index: 2, kind: input, shape index: {}]   ;;  %s3428_s3 = inlined_call_operand.hbm [shape: f32[1,1024], index: 3, kind: input, shape index: {}]   ;;  %s3429_s4 = inlined_call_operand.hbm [shape: f32[8,1024], index: 4, kind: output, shape index: {}]  }
   0x1   :  { %10 = vsyncpa [#allocation6], 0 }
   0x2   :  { %11 = vsyncpa [#allocation9], 0  ;;  %s31_s17 = sshll.u32 %s3426_s1, 4  ;;  %s32_s17 = int_to_ptr.hbm [resolvable:$true] %s31_s17 }
   0x3   :  { %12 = vsyncpa [#allocation4], 0  ;;  %s2192_s18 = smov [#allocation5]   ;;  %s17_s22 = sshll.u32 %s3425_s0, 4  ;;  %s18_s22 = int_to_ptr.hbm [resolvable:$true] %s17_s22 }
   0x4   :  { %s33_s19 = sshll.u32 %s2192_s18, 4  ;;  %s2193_s23 = smov [#allocation2]   ;;  %s34_s19 = int_to_ptr.vmem [resolvable:$true] %s33_s19 }
   0x5   :  { %36 = dma.hbm_to_vmem [thread:$0]  %s32_s17, 128, %s34_s19, [#allocation6]  }
   0x6   :  { %s19_s24 = sshll.u32 %s2193_s23, 4  ;;  %s2194_s25 = smov 128   ;;  %s20_s24 = int_to_ptr.vmem [resolvable:$true] %s19_s24 }
   0x7   :  { %s2195_s26 = smov 8   ;;  %s41_s1 = sshll.u32 %s3427_s2, 4  ;;  %s42_s1 = int_to_ptr.hbm [resolvable:$true] %s41_s1 }
   0x8   :  { %25 = dma.hbm_to_vmem [thread:$0]  %s18_s22, 4096, %s20_s24, [#allocation3], %s2194_s25, %s2194_s25, %s2195_s26  }
   0x9   :  { %s2196_s29 = smov [#allocation7]   ;;  %s55_s0 = sshll.u32 %s3428_s3, 4  ;;  %s56_s0 = int_to_ptr.hbm [resolvable:$true] %s55_s0 }
   0xa   :  { %s43_s30 = sshll.u32 %s2196_s29, 4  ;;  %s2197_s7 = smov [#allocation8]   ;;  %s44_s30 = int_to_ptr.vmem [resolvable:$true] %s43_s30 }
   0xb   :  { %49 = dma.hbm_to_vmem [thread:$0]  %s42_s1, 512, %s44_s30, [#allocation6], %s2194_s25, %s2194_s25, %s2195_s26  }
   0xc   :  { %s57_s8 = sshll.u32 %s2197_s7, 4  ;;  %s58_s8 = int_to_ptr.vmem [resolvable:$true] %s57_s8 }
   0xd   :  { %60 = dma.hbm_to_vmem [thread:$0]  %s56_s0, 128, %s58_s8, [#allocation9]  }
   0xe   :  { %2184 = dma.done.wait [#allocation3], 4096  }
   0xf   :  { %2185 = vsyncadd [#allocation3], 4294963200 }
  0x10   :  { %2186 = dma.done.wait [#allocation6], 640  }
  0x11   :  { %2187 = vsyncadd [#allocation6], 4294966656 }
  0x12   :  { %2188 = dma.done.wait [#allocation9], 128  }
  0x13   :  { %2189 = vsyncadd [#allocation9], 4294967168  ;;  %v112_v0 = vld [vmem:[#allocation7 + $0x18] sm:$0xff]  ;;  %v111_v1 = vld [vmem:[#allocation7 + $0x10] sm:$0xff]  ;;  %vm113_vm0 = vcmask 261120   ;;  %vm324_vm1 = vcmask 1047556  }
  0x14   :  { %222 = vmatpush.msra.mxu0 %v112_v0  ;;  %1840 = vmatpush.msra.mxu1 %v112_v0  ;;  %v110_v2 = vld [vmem:[#allocation7 + $0x8] sm:$0xff]  ;;  %v109_v3 = vld [vmem:[#allocation7] sm:$0xff]  ;;  %v77_v4 = vld [vmem:[#allocation2] sm:$0xff]  ;;  %s2198_s2 = smov 96   ;;  %v2199_v58 = vmov 1983009808  }
  0x15   :  { %1841 = vmatpush.msra.mxu2 %v112_v0  ;;  %1842 = vmatpush.msra.mxu3 %v112_v0  ;;  %v87_v5 = vld [vmem:[#allocation2 + $0x50] sm:$0xff]  ;;  %v94_v6 = vld [vmem:[#allocation2 + $0x88] sm:$0xff]  ;;  %v101_v7 = vld [vmem:[#allocation2 + $0xc0] sm:$0xff]  ;;  %v329_v59 = vunpack.c.l.s4 %v2199_v58  ;;  %s2201_s3 = smov 64   ;;  %s2202_s9 = smov 32   ;;  %vm869_vm2 = vcmask 523264  }
  0x16   :  { %223 = vmatpush.msra.mxu0 %v111_v1  ;;  %1843 = vmatpush.msra.mxu1 %v111_v1  ;;  %v78_v8 = vld [vmem:[#allocation2 + $0x8] sm:$0xff]  ;;  %v88_v9 = vld [vmem:[#allocation2 + $0x58] sm:$0xff]  ;;  %v95_v10 = vld [vmem:[#allocation2 + $0x90] sm:$0xff]  ;;  %vm871_vm3 = vcmask 785408   ;;  %vm1609_vm4 = vcmask 130048   ;;  %s2203_s10 = smov [#allocation10]  }
  0x17   :  { %1844 = vmatpush.msra.mxu2 %v111_v1  ;;  %1845 = vmatpush.msra.mxu3 %v111_v1  ;;  %v102_v11 = vld [vmem:[#allocation2 + $0xc8] sm:$0xff]  ;;  %v79_v12 = vld [vmem:[#allocation2 + $0x10] sm:$0xff]  ;;  %v89_v13 = vld [vmem:[#allocation2 + $0x60] sm:$0xff]  ;;  %v2300_v61 = vunpack.c.0.s8 %v329_v59  ;;  %s1786_s11 = sshll.u32 %s2203_s10, 4  ;;  %s1788_s14 = sshll.u32 %s3429_s4, 4  ;;  %s1787_s11 = int_to_ptr.vmem [resolvable:$true] %s1786_s11  ;;  %s1789_s14 = int_to_ptr.hbm [resolvable:$true] %s1788_s14 }
  0x18   :  { %224 = vmatpush.msra.mxu0 %v110_v2  ;;  %1846 = vmatpush.msra.mxu1 %v110_v2  ;;  %v96_v14 = vld [vmem:[#allocation2 + $0x98] sm:$0xff]  ;;  %v103_v15 = vld [vmem:[#allocation2 + $0xd0] sm:$0xff]  ;;  %v90_v17 = vld [vmem:[#allocation2 + $0x68] sm:$0xff] }
  0x19   :  { %1847 = vmatpush.msra.mxu2 %v110_v2  ;;  %1848 = vmatpush.msra.mxu3 %v110_v2  ;;  %v80_v16 = vld [vmem:[#allocation2 + $0x18] sm:$0xff]  ;;  %v97_v18 = vld [vmem:[#allocation2 + $0xa0] sm:$0xff]  ;;  %v91_v21 = vld [vmem:[#allocation2 + $0x70] sm:$0xff] }
  0x1a   :  { %225 = vmatpush.msra.mxu0 %v109_v3  ;;  %1849 = vmatpush.msra.mxu1 %v109_v3  ;;  %v104_v19 = vld [vmem:[#allocation2 + $0xd8] sm:$0xff]  ;;  %v81_v20 = vld [vmem:[#allocation2 + $0x20] sm:$0xff]  ;;  %v98_v22 = vld [vmem:[#allocation2 + $0xa8] sm:$0xff] }
  0x1b   :  { %1850 = vmatpush.msra.mxu2 %v109_v3  ;;  %1851 = vmatpush.msra.mxu3 %v109_v3  ;;  %v105_v23 = vld [vmem:[#allocation2 + $0xe0] sm:$0xff]  ;;  %v82_v24 = vld [vmem:[#allocation2 + $0x28] sm:$0xff]  ;;  %v92_v25 = vld [vmem:[#allocation2 + $0x78] sm:$0xff] }
  0x1c   :  { %1800 = vmatmul.msk.f32.vlgmr.msra.gmra.mxu0 %vm113_vm0, %v77_v4  ;;  %1810 = vmatmul.msk.f32.vlgmr.msra.gmra.mxu1 %vm113_vm0, %v87_v5  ;;  %v99_v26 = vld [vmem:[#allocation2 + $0xb0] sm:$0xff]  ;;  %v106_v27 = vld [vmem:[#allocation2 + $0xe8] sm:$0xff]  ;;  %v93_v29 = vld [vmem:[#allocation2 + $0x80] sm:$0xff] }
  0x1d   :  { %1817 = vmatmul.msk.f32.vlgmr.msra.gmra.mxu2 %vm113_vm0, %v94_v6  ;;  %1824 = vmatmul.msk.f32.vlgmr.msra.gmra.mxu3 %vm113_vm0, %v101_v7  ;;  %v83_v28 = vld [vmem:[#allocation2 + $0x30] sm:$0xff]  ;;  %v100_v30 = vld [vmem:[#allocation2 + $0xb8] sm:$0xff]  ;;  %v85_v34 = vld [vmem:[#allocation2 + $0x40] sm:$0xff] }
  0x1e   :  { %v107_v31 = vld [vmem:[#allocation2 + $0xf0] sm:$0xff]  ;;  %v84_v32 = vld [vmem:[#allocation2 + $0x38] sm:$0xff]  ;;  %v86_v35 = vld [vmem:[#allocation2 + $0x48] sm:$0xff] }
  0x1f   :  { %v108_v33 = vld [vmem:[#allocation2 + $0xf8] sm:$0xff] }
  0x24   :  { %1801 = vmatmul.msk.f32.gmra.mxu0 %vm113_vm0, %v78_v8  ;;  %1811 = vmatmul.msk.f32.gmra.mxu1 %vm113_vm0, %v88_v9 }
  0x25   :  { %1818 = vmatmul.msk.f32.gmra.mxu2 %vm113_vm0, %v95_v10  ;;  %1825 = vmatmul.msk.f32.gmra.mxu3 %vm113_vm0, %v102_v11 }
  0x2c   :  { %1802 = vmatmul.msk.f32.gmra.mxu0 %vm113_vm0, %v79_v12  ;;  %1812 = vmatmul.msk.f32.gmra.mxu1 %vm113_vm0, %v89_v13 }
  0x2d   :  { %1819 = vmatmul.msk.f32.gmra.mxu2 %vm113_vm0, %v96_v14  ;;  %1826 = vmatmul.msk.f32.gmra.mxu3 %vm113_vm0, %v103_v15 }
  0x34   :  { %1803 = vmatmul.msk.f32.gmra.mxu0 %vm113_vm0, %v80_v16  ;;  %1813 = vmatmul.msk.f32.gmra.mxu1 %vm113_vm0, %v90_v17 }
  0x35   :  { %1820 = vmatmul.msk.f32.gmra.mxu2 %vm113_vm0, %v97_v18  ;;  %1827 = vmatmul.msk.f32.gmra.mxu3 %vm113_vm0, %v104_v19 }
  0x3c   :  { %1804 = vmatmul.msk.f32.gmra.mxu0 %vm113_vm0, %v81_v20  ;;  %1814 = vmatmul.msk.f32.gmra.mxu1 %vm113_vm0, %v91_v21 }
  0x3d   :  { %1821 = vmatmul.msk.f32.gmra.mxu2 %vm113_vm0, %v98_v22  ;;  %1828 = vmatmul.msk.f32.gmra.mxu3 %vm113_vm0, %v105_v23 }
  0x44   :  { %1805 = vmatmul.msk.f32.gmra.mxu0 %vm113_vm0, %v82_v24  ;;  %1815 = vmatmul.msk.f32.gmra.mxu1 %vm113_vm0, %v92_v25 }
  0x45   :  { %1822 = vmatmul.msk.f32.gmra.mxu2 %vm113_vm0, %v99_v26  ;;  %1829 = vmatmul.msk.f32.gmra.mxu3 %vm113_vm0, %v106_v27 }
  0x4c   :  { %1806 = vmatmul.msk.f32.gmra.mxu0 %vm113_vm0, %v83_v28  ;;  %1816 = vmatmul.msk.f32.gmra.mxu1 %vm113_vm0, %v93_v29 }
  0x4d   :  { %1823 = vmatmul.msk.f32.gmra.mxu2 %vm113_vm0, %v100_v30  ;;  %1830 = vmatmul.msk.f32.gmra.mxu3 %vm113_vm0, %v107_v31 }
  0x54   :  { %1807 = vmatmul.msk.f32.gmra.mxu0 %vm113_vm0, %v84_v32 }
  0x55   :  { %1831 = vmatmul.msk.f32.gmra.mxu3 %vm113_vm0, %v108_v33 }
  0x5c   :  { %1808 = vmatmul.msk.f32.gmra.mxu0 %vm113_vm0, %v85_v34 }
  0x64   :  { %1809 = vmatmul.msk.f32.gmra.mxu0 %vm113_vm0, %v86_v35 }
  0x99   :  { %v2273_v36 = vpop.f32.mrf.mxu0  ;;  %v2275_v37 = vpop.f32.mrf.mxu1 }
  0x9a   :  { %v548_v60 = vrot.slane %v2275_v37, 4  ;;  %v326_v21 = vrot.slane %v2273_v36, 4 }
  0xa0   :  { %v278_v38 = vpop.f32.mrf.mxu2  ;;  %v2277_v39 = vpop.f32.mrf.mxu3 }
  0xa1   :  { %v2279_v40 = vpop.f32.mrf.mxu0  ;;  %v2281_v41 = vpop.f32.mrf.mxu1  ;;  %v462_v42 = vrot.slane %v278_v38, 4  ;;  %v348_v24 = vrot.slane %v2277_v39, 4 }
  0xa2   :  { %v660_v50 = vrot.slane %v2281_v41, 4  ;;  %v438_v25 = vrot.slane %v2279_v40, 4 }
  0xa8   :  { %v281_v43 = vpop.f32.mrf.mxu2  ;;  %v302_v44 = vpop.f32.mrf.mxu3 }
  0xa9   :  { %v463_v45 = vsel %vm324_vm1, %v302_v44, %v462_v42  ;;  %v233_v46 = vpop.f32.mrf.mxu0  ;;  %v263_v47 = vpop.f32.mrf.mxu1  ;;  %v1864_v48 = vpack.i.bf16 %v281_v43, %v278_v38  ;;  %v460_v62 = vrot.slane %v302_v44, 4  ;;  %v574_v63 = vrot.slane %v281_v43, 4 }
  0xaa   :  { %v1874_v49 = vpack.i.bf16 %v233_v46, %v2279_v40  ;;  %v1869_v53 = vpack.i.bf16 %v263_v47, %v2273_v36  ;;  %v550_v0 = vrot.slane %v233_v46, 4  ;;  %v336_v1 = vrot.slane %v263_v47, 4 }
  0xab   :  { %1865 = vrot.lane.b32.xlu0 %v1864_v48, %s2198_s2  ;;  %v2305_v4 = vperm.slane %v463_v45, %v2300_v61  ;;  %v549_v5 = vsel %vm324_vm1, %v548_v60, %v233_v46  ;;  %v461_v14 = vsel %vm324_vm1, %v460_v62, %v278_v38  ;;  %v2200_v42 = vmov 1934713408  }
  0xac   :  { %1875 = vrot.lane.b32.xlu1 %v1874_v49, %s2198_s2  ;;  %v551_v18 = vsel %vm324_vm1, %v2275_v37, %v550_v0  ;;  %v2328_v19 = vperm.slane %v549_v5, %v2300_v61  ;;  %v2337_v26 = vperm.slane %v461_v14, %v2300_v61 }
  0xad   :  { %v522_v28 = vrot.slane %v2305_v4, 4  ;;  %v2342_v29 = vperm.slane %v551_v18, %v2300_v61 }
  0xae   :  { %v598_v32 = vrot.slane %v2328_v19, 4  ;;  %v510_v62 = vrot.slane %v2337_v26, 4 }
  0xb0   :  { %v2288_v51 = vpop.f32.mrf.mxu2  ;;  %v305_v52 = vpop.f32.mrf.mxu3 }
  0xb1   :  { %v2291_v54 = vpop.f32.mrf.mxu0  ;;  %v2293_v55 = vpop.f32.mrf.mxu1  ;;  %v1879_v56 = vpack.i.bf16 %v305_v52, %v302_v44  ;;  %v572_v10 = vrot.slane %v305_v52, 4  ;;  %v686_v15 = vrot.slane %v2288_v51, 4  ;;  %v575_v22 = vsel %vm324_vm1, %v305_v52, %v574_v63 }
  0xb2   :  { %v661_v57 = vsel %vm324_vm1, %v660_v50, %v2291_v54  ;;  %v662_v16 = vrot.slane %v2291_v54, 4  ;;  %v2350_v33 = vperm.slane %v575_v22, %v2300_v61  ;;  %v448_v34 = vrot.slane %v2293_v55, 4 }
  0xb3   :  { %1870 = vrot.lane.b32.xlu0 %v1869_v53, %s2198_s2  ;;  %1880 = vrot.lane.b32.xlu2 %v1879_v56, %s2198_s2  ;;  %v573_v27 = vsel %vm324_vm1, %v572_v10, %v281_v43  ;;  %v377_v43 = vunpack.c.l.s4 %v2200_v42  ;;  %v2359_v45 = vperm.slane %v661_v57, %v2300_v61 }
  0xb4   :  { %v663_v30 = vsel %vm324_vm1, %v2281_v41, %v662_v16  ;;  %v2356_v44 = vperm.slane %v573_v27, %v2300_v61 }
  0xb5   :  { %v2369_v50 = vperm.slane %v663_v30, %v2300_v61  ;;  %v710_v10 = vrot.slane %v2359_v45, 4 }
  0xb8   :  { %v287_v2 = vpop.f32.mrf.mxu2  ;;  %v2302_v3 = vpop.f32.mrf.mxu3 }
  0xb9   :  { %v1884_v6 = vpack.i.bf16 %v2277_v39, %v287_v2  ;;  %v684_v7 = vrot.slane %v2302_v3, 4  ;;  %v2310_v8 = vpop.f32.mrf.mxu0  ;;  %v2312_v9 = vpop.f32.mrf.mxu1  ;;  %v362_v23 = vrot.slane %v287_v2, 4  ;;  %v687_v31 = vsel %vm324_vm1, %v2302_v3, %v686_v15 }
  0xba   :  { %v337_v11 = vsel %vm324_vm1, %v336_v1, %v2310_v8  ;;  %v338_v12 = vrot.slane %v2310_v8, 4  ;;  %v1889_v13 = vpack.i.bf16 %v2312_v9, %v2293_v55  ;;  %v2372_v52 = vperm.slane %v687_v31, %v2300_v61 }
  0xbb   :  { %v685_v17 = vsel %vm324_vm1, %v684_v7, %v2288_v51  ;;  %1885 = vrot.lane.b32.xlu1 %v1884_v6, %s2198_s2  ;;  %v2375_v53 = vperm.slane %v337_v11, %v2300_v61  ;;  %v2398_v7 = vunpack.c.0.s8 %v377_v43  ;;  %v560_v15 = vrot.slane %v2312_v9, 4 }
  0xbc   :  { %v339_v20 = vsel %vm324_vm1, %v263_v47, %v338_v12  ;;  %1890 = vrot.lane.b32.xlu2 %v1889_v13, %s2198_s2  ;;  %v2379_v57 = vperm.slane %v685_v17, %v2300_v61  ;;  %v746_v13 = vrot.slane %v2372_v52, 4 }
  0xbd   :  { %v2388_v63 = vperm.slane %v339_v20, %v2300_v61 }
  0xbf   :  { %v384_v16 = vrot.slane %v2388_v63, 4 }
  0xc0   :  { %v290_v35 = vpop.f32.mrf.mxu2  ;;  %v2353_v38 = vpop.f32.mrf.mxu3 }
  0xc1   :  { %v360_v46 = vrot.slane %v2353_v38, 4  ;;  %v363_v47 = vsel %vm324_vm1, %v2353_v38, %v362_v23  ;;  %v2364_v48 = vpop.f32.mrf.mxu0  ;;  %v2366_v49 = vpop.f32.mrf.mxu1  ;;  %v474_v6 = vrot.slane %v290_v35, 4 }
  0xc2   :  { %v450_v56 = vrot.slane %v2364_v48, 4  ;;  %v449_v59 = vsel %vm324_vm1, %v448_v34, %v2364_v48  ;;  %v1894_v60 = vpack.i.bf16 %v2366_v49, %v2291_v54  ;;  %v2391_v0 = vperm.slane %v363_v47, %v2300_v61 }
  0xc3   :  { %v361_v58 = vsel %vm324_vm1, %v360_v46, %v287_v2  ;;  %v634_v2 = vrot.slane %v2350_v33, 4  ;;  %v622_v54 = vrot.slane %v2356_v44, 4  ;;  %v2404_v12 = vperm.slane %v449_v59, %v2300_v61 }
  0xc4   :  { %v451_v1 = vsel %vm324_vm1, %v2293_v55, %v450_v56  ;;  %1895 = vrot.lane.b32.xlu1 %v1894_v60, %s2198_s2  ;;  %v2412_v17 = vperm.slane %v361_v58, %v2300_v61  ;;  %v672_v20 = vrot.slane %v2366_v49, 4 }
  0xc5   :  { %v2417_v27 = vperm.slane %v451_v1, %v2300_v61  ;;  %v484_v46 = vrot.slane %v2404_v12, 4 }
  0xc6   :  { %v396_v55 = vrot.slane %v2412_v17, 4 }
  0xc8   :  { %v293_v22 = vpop.f32.mrf.mxu2  ;;  %v314_v23 = vpop.f32.mrf.mxu3 }
  0xc9   :  { %v1899_v30 = vpack.i.bf16 %v293_v22, %v290_v35  ;;  %v472_v31 = vrot.slane %v314_v23, 4  ;;  %v475_v34 = vsel %vm324_vm1, %v314_v23, %v474_v6  ;;  %v2420_v42 = vpop.f32.mrf.mxu0  ;;  %v275_v43 = vpop.f32.mrf.mxu1 }
  0xca   :  { %v2424_v47 = vperm.slane %v475_v34, %v2300_v61  ;;  %v561_v56 = vsel %vm324_vm1, %v560_v15, %v2420_v42  ;;  %v562_v58 = vrot.slane %v2420_v42, 4  ;;  %v349_v1 = vsel %vm324_vm1, %v348_v24, %v275_v43 }
  0xcb   :  { %v473_v59 = vsel %vm324_vm1, %v472_v31, %v290_v35  ;;  %v567_v60 = vperm.slane %v561_v56, %v2300_v61  ;;  %v350_v6 = vrot.slane %v275_v43, 4  ;;  %1900 = vrot.lane.b32.xlu2 %v1899_v30, %s2198_s2  ;;  %v496_v31 = vrot.slane %v2417_v27, 4 }
  0xcc   :  { %v2437_v34 = vperm.slane %v473_v59, %v2300_v61  ;;  %v2443_v15 = vsel %vm324_vm1, %v2424_v47, %v522_v28  ;;  %v563_v35 = vsel %vm324_vm1, %v2312_v9, %v562_v58  ;;  %v586_v59 = vrot.slane %v293_v22, 4 }
  0xcd   :  { %v2449_v24 = vperm.slane %v563_v35, %v2300_v61  ;;  %v596_v30 = vrot.slane %v567_v60, 4  ;;  %v351_v56 = vsel %vm324_vm1, %v2277_v39, %v350_v6  ;;  %v599_v11 = vsel %vm324_vm1, %v567_v60, %v598_v32 }
  0xce   :  { %v2457_v28 = vperm.slane %v349_v1, %v2300_v61  ;;  %v1904_v5 = vpack.i.bf16 %v275_v43, %v2310_v8  ;;  %v1909_v58 = vpack.i.bf16 %v2420_v42, %v2364_v48  ;;  %v511_v39 = vsel %vm324_vm1, %v2437_v34, %v510_v62 }
  0xcf   :  { %v608_v35 = vrot.slane %v2449_v24, 4  ;;  %v508_v6 = vrot.slane %v2437_v34, 4  ;;  %v2469_v32 = vsel %vm324_vm1, %v596_v30, %v2328_v19  ;;  %v2472_v60 = vperm.slane %v351_v56, %v2300_v61 }
  0xd0   :  { %v2476_v8 = vsel %vm324_vm1, %v396_v55, %v2457_v28  ;;  %1905 = vrot.lane.b32.xlu0 %v1904_v5, %s2198_s2  ;;  %v317_v48 = vpop.f32.mrf.mxu3  ;;  %v398_v42 = vrot.slane %v2457_v28, 4  ;;  %v2483_v34 = vperm.slane %v599_v11, %v2398_v7  ;;  %v2490_v56 = vperm.slane %v511_v39, %v2398_v7  ;;  %v296_v5 = vpop.f32.mrf.mxu2 }
  0xd1   :  { %v1914_v43 = vpack.i.bf16 %v317_v48, %v314_v23  ;;  %v584_v62 = vrot.slane %v317_v48, 4  ;;  %v2480_v1 = vpop.f32.mrf.mxu0  ;;  %v587_v19 = vsel %vm324_vm1, %v317_v48, %v586_v59  ;;  %v609_v11 = vsel %vm324_vm1, %v608_v35, %v2342_v29 }
  0xd2   :  { %v673_v30 = vsel %vm324_vm1, %v672_v20, %v2480_v1  ;;  %v674_v55 = vrot.slane %v2480_v1, 4  ;;  %v595_v23 = vperm.slane %v587_v19, %v2300_v61  ;;  %v698_v59 = vrot.slane %v296_v5, 4 }
  0xd3   :  { %v585_v9 = vsel %vm324_vm1, %v584_v62, %v293_v22  ;;  %v679_v14 = vperm.slane %v673_v30, %v2300_v61  ;;  %1915 = vrot.lane.b32.xlu2 %v1914_v43, %s2198_s2  ;;  %v2502_v39 = vperm.slane %v609_v11, %v2398_v7  ;;  %v410_v35 = vrot.slane %v2472_v60, 4 }
  0xd4   :  { %v591_v20 = vperm.slane %v585_v9, %v2300_v61  ;;  %v675_v48 = vsel %vm324_vm1, %v2366_v49, %v674_v55  ;;  %v632_v18 = vrot.slane %v595_v23, 4  ;;  %v2507_v22 = vsel %vm324_vm1, %v595_v23, %v634_v2 }
  0xd5   :  { %v2510_v43 = vperm.slane %v675_v48, %v2300_v61  ;;  %v708_v62 = vrot.slane %v679_v14, 4  ;;  %v1919_v9 = vpack.i.bf16 %v2302_v3, %v296_v5  ;;  %v711_v49 = vsel %vm324_vm1, %v679_v14, %v710_v10 }
  0xd6   :  { %v623_v19 = vsel %vm324_vm1, %v591_v20, %v622_v54  ;;  %v1924_v2 = vpack.i.bf16 %v2288_v51, %v2480_v1  ;;  %v536_v23 = vrot.slane %v2490_v56, 4  ;;  %v620_v3 = vrot.slane %v591_v20, 4 }
  0xd7   :  { %v2524_v30 = vsel %vm324_vm1, %v708_v62, %v2359_v45  ;;  %v720_v55 = vrot.slane %v2510_v43, 4  ;;  %v2529_v11 = vperm.slane %v711_v49, %v2398_v7  ;;  %v633_v54 = vsel %vm324_vm1, %v632_v18, %v2350_v33 }
  0xd8   :  { %1910 = vrot.lane.b32.xlu0 %v1909_v58, %s2198_s2  ;;  %v2532_v10 = vpop.f32.mrf.mxu3  ;;  %v654_v51 = vrot.slane %v2502_v39, 4  ;;  %v2543_v48 = vperm.slane %v623_v19, %v2398_v7  ;;  %v509_v19 = vsel %vm324_vm1, %v508_v6, %v2337_v26 }
  0xd9   :  { %v696_v45 = vrot.slane %v2532_v10, 4  ;;  %v699_v14 = vsel %vm324_vm1, %v2532_v10, %v698_v59  ;;  %v251_v1 = vpop.f32.mrf.mxu0  ;;  %v721_v20 = vsel %vm324_vm1, %v720_v55, %v2369_v50  ;;  %v2554_v55 = vperm.slane %v633_v54, %v2398_v7 }
  0xda   :  { %v707_v58 = vperm.slane %v699_v14, %v2300_v61  ;;  %v1934_v62 = vpack.i.bf16 %v2353_v38, %v251_v1  ;;  %v323_v49 = vrot.slane %v251_v1, 4  ;;  %v327_v33 = vsel %vm324_vm1, %v251_v1, %v326_v21 }
  0xdb   :  { %v697_v18 = vsel %vm324_vm1, %v696_v45, %v296_v5  ;;  %v335_v59 = vperm.slane %v327_v33, %v2300_v61  ;;  %1920 = vrot.lane.b32.xlu2 %v1919_v9, %s2198_s2  ;;  %v2576_v54 = vperm.slane %v721_v20, %v2398_v7  ;;  %v2585_v1 = vperm.slane %v2469_v32, %v2398_v7 }
  0xdc   :  { %v2559_v14 = vperm.slane %v697_v18, %v2300_v61  ;;  %v744_v38 = vrot.slane %v707_v58, 4  ;;  %v2564_v21 = vsel %vm324_vm1, %v707_v58, %v746_v13  ;;  %v325_v5 = vsel %vm324_vm1, %v323_v49, %v2273_v36  ;;  %1935 = vrot.lane.b32.xlu1 %v1934_v62, %s2198_s2 }
  0xdd   :  { %v2570_v9 = vperm.slane %v325_v5, %v2300_v61  ;;  %v385_v26 = vsel %vm324_vm1, %v384_v16, %v335_v59  ;;  %v386_v6 = vrot.slane %v335_v59, 4  ;;  %v1929_v13 = vpack.i.bf16 %v2532_v10, %v2281_v41 }
  0xde   :  { %v745_v45 = vsel %vm324_vm1, %v744_v38, %v2372_v52  ;;  %v648_v36 = vrot.slane %v2543_v48, 4  ;;  %v652_v16 = vrot.slane %v2554_v55, 4  ;;  %v766_v62 = vrot.slane %v2576_v54, 4 }
  0xdf   :  { %v387_v58 = vsel %vm324_vm1, %v2388_v63, %v386_v6  ;;  %v2591_v20 = vperm.slane %v745_v45, %v2398_v7  ;;  %v732_v41 = vrot.slane %v2559_v14, 4  ;;  %v2598_v52 = vsel %vm324_vm1, %v2554_v55, %v654_v51 }
  0xe0   :  { %1925 = vrot.lane.b32.xlu0 %v1924_v2, %s2198_s2  ;;  %v2601_v32 = vperm.slane %v509_v19, %v2398_v7  ;;  %v621_v63 = vsel %vm324_vm1, %v620_v3, %v2356_v44  ;;  %v374_v10 = vrot.slane %v2570_v9, 4  ;;  %v2607_v49 = vperm.slane %v385_v26, %v2398_v7 }
  0xe1   :  { %v254_v33 = vpop.f32.mrf.mxu0  ;;  %v2611_v18 = vsel %vm324_vm1, %v2591_v20, %v766_v62  ;;  %v2614_v2 = vperm.slane %v621_v63, %v2398_v7  ;;  %v649_v3 = vsel %vm324_vm1, %v648_v36, %v2483_v34  ;;  %v764_v38 = vrot.slane %v2591_v20, 4 }
  0xe2   :  { %v1944_v51 = vpack.i.bf16 %v2275_v37, %v254_v33  ;;  %v436_v59 = vrot.slane %v254_v33, 4  ;;  %v439_v44 = vsel %vm324_vm1, %v254_v33, %v438_v25  ;;  %v1939_v5 = vpack.i.bf16 %v2611_v18, %v2598_v52 }
  0xe3   :  { %v447_v19 = vperm.slane %v439_v44, %v2300_v61  ;;  %v646_v26 = vrot.slane %v2585_v1, 4  ;;  %v532_v6 = vrot.slane %v2601_v32, 4  ;;  %v395_v25 = vperm.slane %v387_v58, %v2398_v7 }
  0xe4   :  { %v437_v37 = vsel %vm324_vm1, %v436_v59, %v2279_v40  ;;  %1945 = vrot.lane.b32.xlu1 %v1944_v51, %s2198_s2  ;;  %v411_v45 = vsel %vm324_vm1, %v2391_v0, %v410_v35  ;;  %v644_v40 = vrot.slane %v2614_v2, 4  ;;  %v375_v58 = vsel %vm324_vm1, %v2375_v53, %v374_v10 }
  0xe5   :  { %v443_v36 = vperm.slane %v437_v37, %v2300_v61  ;;  %v497_v62 = vsel %vm324_vm1, %v496_v31, %v447_v19  ;;  %v498_v52 = vrot.slane %v447_v19, 4  ;;  %v419_v63 = vperm.slane %v411_v45, %v2398_v7 }
  0xe6   :  { %v434_v33 = vrot.slane %v395_v25, 4  ;;  %v399_v35 = vsel %vm324_vm1, %v2412_v17, %v398_v42  ;;  %v383_v59 = vperm.slane %v375_v58, %v2398_v7  ;;  %v430_v37 = vrot.slane %v2607_v49, 4 }
  0xe7   :  { %v485_v18 = vsel %vm324_vm1, %v484_v46, %v443_v36  ;;  %v486_v51 = vrot.slane %v443_v36, 4  ;;  %v499_v31 = vsel %vm324_vm1, %v2417_v27, %v498_v52  ;;  %v407_v17 = vperm.slane %v399_v35, %v2398_v7 }
  0xe8   :  { %v507_v44 = vperm.slane %v499_v31, %v2398_v7  ;;  %1930 = vrot.lane.b32.xlu0 %v1929_v13, %s2198_s2  ;;  %v2657_v10 = vperm.slane %v485_v18, %v2398_v7  ;;  %v2660_v28 = vsel %vm324_vm1, %v419_v63, %v434_v33  ;;  %v426_v42 = vrot.slane %v383_v59, 4 }
  0xe9   :  { %v487_v46 = vsel %vm324_vm1, %v2404_v12, %v486_v51  ;;  %v3445_v27 = vrot.slane %v2391_v0, 4  ;;  %v647_v36 = vsel %vm324_vm1, %v2614_v2, %v646_v26  ;;  %v432_v33 = vrot.slane %v419_v63, 4 }
  0xea   :  { %v2671_v13 = vperm.slane %v487_v46, %v2398_v7  ;;  %v534_v45 = vrot.slane %v2657_v10, 4  ;;  %v2678_v12 = vsel %vm324_vm1, %v407_v17, %v426_v42  ;;  %v546_v58 = vrot.slane %v507_v44, 4 }
  0xeb   :  { %v409_v19 = vsel %vm324_vm1, %v3445_v27, %v2472_v60  ;;  %v3446_v0 = vrot.slane %v2375_v53, 4  ;;  %v503_v35 = vperm.slane %v497_v62, %v2398_v7  ;;  %v531_v51 = vperm.slane %v2443_v15, %v2398_v7 }
  0xec   :  { %v415_v52 = vperm.slane %v409_v19, %v2398_v7  ;;  %v537_v18 = vsel %vm324_vm1, %v536_v23, %v2671_v13  ;;  %v535_v26 = vsel %vm324_vm1, %v2601_v32, %v534_v45  ;;  %v538_v31 = vrot.slane %v2671_v13, 4 }
  0xed   :  { %v373_v60 = vsel %vm324_vm1, %v3446_v0, %v2570_v9  ;;  %v1954_v63 = vpack.i.bf16 %v649_v3, %v537_v18  ;;  %v2698_v9 = vsel %vm324_vm1, %v432_v33, %v395_v25  ;;  %v2701_v46 = vsel %vm324_vm1, %v531_v51, %v546_v58 }
  0xee   :  { %v2695_v53 = vsel %vm324_vm1, %v415_v52, %v430_v37  ;;  %v428_v62 = vrot.slane %v415_v52, 4  ;;  %v379_v23 = vperm.slane %v373_v60, %v2398_v7  ;;  %v403_v42 = vperm.slane %v2476_v8, %v2398_v7 }
  0xef   :  { %1955 = vrot.lane.b32.xlu2 %v1954_v63, %s2201_s3  ;;  %v1949_v15 = vpack.i.bf16 %v647_v36, %v535_v26  ;;  %v424_v3 = vrot.slane %v407_v17, 4  ;;  %v3447_v27 = vrot.slane %v2342_v29, 4  ;;  %v643_v19 = vperm.slane %v2507_v22, %v2398_v7 }
  0xf0   :  { %1940 = vrot.lane.b32.xlu0 %v1939_v5, %s2202_s9  ;;  %v420_v37 = vrot.slane %v403_v42, 4  ;;  %v422_v13 = vrot.slane %v379_v23, 4  ;;  %v3448_v45 = vrot.slane %v2369_v50, 4  ;;  %v755_v22 = vperm.slane %v2564_v21, %v2398_v7 }
  0xf1   :  { %v611_v25 = vsel %vm324_vm1, %v2449_v24, %v3447_v27  ;;  %v2720_v29 = vsel %vm324_vm1, %v424_v3, %v383_v59  ;;  %v3449_v5 = vrot.slane %v2424_v47, 4  ;;  %v544_v59 = vrot.slane %v531_v51, 4 }
  0xf2   :  { %v619_v8 = vperm.slane %v611_v25, %v2398_v7  ;;  %v723_v17 = vsel %vm324_vm1, %v2510_v43, %v3448_v45  ;;  %v2730_v52 = vsel %vm324_vm1, %v403_v42, %v422_v13  ;;  %v542_v43 = vrot.slane %v503_v35, 4 }
  0xf3   :  { %v731_v24 = vperm.slane %v723_v17, %v2398_v7  ;;  %v521_v36 = vsel %vm324_vm1, %v3449_v5, %v2305_v4  ;;  %v3450_v0 = vrot.slane %v2379_v57, 4  ;;  %v762_v21 = vrot.slane %v2529_v11, 4 }
  0xf4   :  { %v658_v50 = vrot.slane %v619_v8, 4  ;;  %v527_v33 = vperm.slane %v521_v36, %v2398_v7  ;;  %v2749_v51 = vsel %vm324_vm1, %v544_v59, %v507_v44  ;;  %v656_v42 = vrot.slane %v643_v19, 4 }
  0xf5   :  { %v770_v58 = vrot.slane %v731_v24, 4  ;;  %v735_v60 = vsel %vm324_vm1, %v2559_v14, %v3450_v0  ;;  %3452 = vst [vmem:[#allocation16_spill] sm:$0xff] %v2749_v51  ;;  %v768_v3 = vrot.slane %v755_v22, 4  ;;  %v715_v45 = vperm.slane %v2524_v30, %v2398_v7 }
  0xf6   :  { %v2739_v47 = vsel %vm324_vm1, %v643_v19, %v658_v50  ;;  %v540_v4 = vrot.slane %v527_v33, 4  ;;  %v2742_v18 = vsel %vm324_vm1, %v527_v33, %v542_v43  ;;  %v743_v26 = vperm.slane %v735_v60, %v2398_v7 }
  0xf7   :  { %3451 = vst [vmem:[#allocation15_spill] sm:$0xff] %v2742_v18  ;;  %v2746_v63 = vsel %vm324_vm1, %v755_v22, %v770_v58  ;;  %v2759_v17 = vsel %vm324_vm1, %v656_v42, %v619_v8  ;;  %v2762_v5 = vsel %vm324_vm1, %v768_v3, %v731_v24  ;;  %v733_v44 = vsel %vm324_vm1, %v732_v41, %v2379_v57 }
  0xf8   :  { %v2754_v25 = vsel %vm324_vm1, %v743_v26, %v762_v21  ;;  %v760_v13 = vrot.slane %v743_v26, 4  ;;  %3454 = vst [vmem:[#allocation18_spill] sm:$0xff] %v2759_v17  ;;  %v2770_v19 = vsel %vm324_vm1, %v428_v62, %v2607_v49  ;;  %1950 = vrot.lane.b32.xlu0 %v1949_v15, %s2202_s9  ;;  %v739_v24 = vperm.slane %v733_v44, %v2398_v7 }
  0xf9   :  { %3453 = vst [vmem:[#allocation17_spill] sm:$0xff] %v2754_v25  ;;  %v758_v22 = vrot.slane %v715_v45, 4  ;;  %v2781_v14 = vsel %vm324_vm1, %v420_v37, %v379_v23  ;;  %v2784_v57 = vsel %vm324_vm1, %v540_v4, %v503_v35  ;;  %v2790_v41 = vsel %vm324_vm1, %v532_v6, %v2657_v10 }
  0xfa   :  { %3455 = vst [vmem:[#allocation19_spill] sm:$0xff] %v2762_v5  ;;  %v2777_v8 = vsel %vm324_vm1, %v760_v13, %v2529_v11  ;;  %v2796_v11 = vsel %vm324_vm1, %v644_v40, %v2585_v1  ;;  %v756_v49 = vrot.slane %v739_v24, 4  ;;  %v2805_v35 = vsel %vm324_vm1, %v652_v16, %v2502_v39 }
  0xfb   :  { %3456 = vst [vmem:[#allocation20_spill] sm:$0xff] %v2770_v19  ;;  %v2799_v62 = vsel %vm324_vm1, %v739_v24, %v758_v22  ;;  %v2811_v32 = vsel %vm324_vm1, %v764_v38, %v2576_v54  ;;  %v539_v1 = vsel %vm324_vm1, %v2490_v56, %v538_v31  ;;  %v650_v2 = vrot.slane %v2483_v34, 4 }
  0xfc   :  { %3457 = vst [vmem:[#allocation21_spill] sm:$0xff] %v2777_v8  ;;  %v2817_v6 = vsel %vm324_vm1, %v756_v49, %v715_v45 }
  0xfd   :  { %3458 = vst [vmem:[#allocation22_spill] sm:$0xff] %v2781_v14  ;;  %v651_v55 = vsel %vm324_vm1, %v2543_v48, %v650_v2 }
  0xfe   :  { %3459 = vst [vmem:[#allocation23_spill] sm:$0xff] %v2784_v57  ;;  %v1959_v40 = vpack.i.bf16 %v651_v55, %v539_v1 }
  0xff   :  { %3460 = vst [vmem:[#allocation24_spill] sm:$0xff] %v2790_v41 }
 0x100   :  { %3461 = vst [vmem:[#allocation25_spill] sm:$0xff] %v2796_v11  ;;  %1960 = vrot.lane.b32.xlu0 %v1959_v40, %s2198_s2 }
 0x101   :  { %3462 = vst [vmem:[#allocation26_spill] sm:$0xff] %v2799_v62 }
 0x102   :  { %3463 = vst [vmem:[#allocation27_spill] sm:$0xff] %v2805_v35 }
 0x103   :  { %3464 = vst [vmem:[#allocation28_spill] sm:$0xff] %v2811_v32 }
 0x104   :  { %3465 = vst [vmem:[#allocation29_spill] sm:$0xff] %v2817_v6 }
 0x10d   :  { %v1881_v39 = vpop.permute.xlu2 %1880 }
 0x10e   :  { %v1883_v23 = vunpack.i.h.bf16 %v1881_v39  ;;  %v1882_v48 = vunpack.i.l.bf16 %v1881_v39 }
 0x110   :  { %v1270_v58 = vrot.slane %v1883_v23, 4  ;;  %v1158_v21 = vrot.slane %v1882_v48, 4 }
 0x116   :  { %v2822_v16 = vpop.permute.xlu2 %1890 }
 0x117   :  { %v3434_v26 = vunpack.i.h.bf16 %v2822_v16  ;;  %v3432_v42 = vunpack.i.l.bf16 %v2822_v16 }
 0x119   :  { %v2846_v40 = vrot.slane %v3434_v26, 4  ;;  %v2850_v39 = vrot.slane %v3432_v42, 4 }
 0x11d   :  { %v1866_v54 = vpop.permute.xlu0 %1865 }
 0x11e   :  { %v2824_v38 = vpop.permute.xlu1 %1875  ;;  %v1868_v56 = vunpack.i.h.bf16 %v1866_v54  ;;  %v1867_v15 = vunpack.i.l.bf16 %v1866_v54 }
 0x11f   :  { %v3431_v54 = vunpack.i.h.bf16 %v2824_v38 }
 0x120   :  { %v1272_v50 = vrot.slane %v1868_v56, 4  ;;  %v1160_v59 = vrot.slane %v1867_v15, 4  ;;  %v1271_v3 = vsel %vm324_vm1, %v1270_v58, %v1868_v56  ;;  %v1159_v13 = vsel %vm324_vm1, %v1158_v21, %v1867_v15 }
 0x121   :  { %v2842_v55 = vperm.slane %v1271_v3, %v2300_v61  ;;  %v2871_v3 = vrot.slane %v3431_v54, 4 }
 0x122   :  { %v1273_v4 = vsel %vm324_vm1, %v1883_v23, %v1272_v50  ;;  %v1161_v49 = vsel %vm324_vm1, %v1882_v48, %v1160_v59 }
 0x123   :  { %v1281_v22 = vperm.slane %v1273_v4, %v2300_v61  ;;  %3466 = vst [vmem:[#allocation30_spill] sm:$0xff] %v2842_v55  ;;  %v1169_v56 = vperm.slane %v1161_v49, %v2300_v61 }
 0x125   :  { %v1901_v20 = vpop.permute.xlu2 %1900  ;;  %v2826_v34 = vpop.permute.xlu0 %1870  ;;  %v1220_v59 = vrot.slane %v1169_v56, 4 }
 0x126   :  { %v1903_v10 = vunpack.i.h.bf16 %v1901_v20  ;;  %v1902_v33 = vunpack.i.l.bf16 %v1901_v20  ;;  %v2853_v20 = vperm.slane %v1159_v13, %v2300_v61  ;;  %v1873_v48 = vunpack.i.h.bf16 %v2826_v34 }
 0x128   :  { %v1284_v37 = vrot.slane %v1903_v10, 4  ;;  %v1172_v45 = vrot.slane %v1902_v33, 4 }
 0x12d   :  { %v1916_v31 = vpop.permute.xlu2 %1915  ;;  %v2828_v43 = vpop.permute.xlu1 %1885 }
 0x12e   :  { %v1918_v36 = vunpack.i.h.bf16 %v1916_v31  ;;  %v1917_v0 = vunpack.i.l.bf16 %v1916_v31  ;;  %v3430_v31 = vunpack.i.l.bf16 %v2824_v38  ;;  %v1888_v21 = vunpack.i.h.bf16 %v2828_v43 }
 0x12f   :  { %v3435_v4 = vunpack.i.l.bf16 %v2828_v43 }
 0x130   :  { %v1285_v60 = vsel %vm324_vm1, %v1918_v36, %v1284_v37  ;;  %v1282_v1 = vrot.slane %v1918_v36, 4  ;;  %v1170_v2 = vrot.slane %v1917_v0, 4  ;;  %v1173_v23 = vsel %vm324_vm1, %v1917_v0, %v1172_v45 }
 0x131   :  { %v1293_v44 = vperm.slane %v1285_v60, %v2300_v61  ;;  %v1332_v36 = vrot.slane %v1281_v22, 4  ;;  %v3433_v60 = vunpack.i.l.bf16 %v2826_v34  ;;  %v1181_v13 = vperm.slane %v1173_v23, %v2300_v61 }
 0x132   :  { %v1171_v50 = vsel %vm324_vm1, %v1170_v2, %v1902_v33  ;;  %v1283_v58 = vsel %vm324_vm1, %v1282_v1, %v1903_v10  ;;  %v2889_v23 = vrot.slane %v3430_v31, 4  ;;  %v1060_v27 = vrot.slane %v3435_v4, 4 }
 0x133   :  { %v1330_v15 = vrot.slane %v1293_v44, 4  ;;  %v1333_v33 = vsel %vm324_vm1, %v1293_v44, %v1332_v36  ;;  %v2876_v10 = vperm.slane %v1171_v50, %v2300_v61  ;;  %v2879_v45 = vperm.slane %v1283_v58, %v2300_v61 }
 0x134   :  { %v1034_v44 = vrot.slane %v1873_v48, 4  ;;  %v1024_v50 = vrot.slane %v3433_v60, 4  ;;  %v1046_v58 = vrot.slane %v1888_v21, 4  ;;  %v2897_v0 = vperm.slane %v1333_v33, %v2398_v7 }
 0x135   :  { %3467 = vst [vmem:[#allocation31_spill] sm:$0xff] %v2879_v45  ;;  %v2881_v49 = vpop.permute.xlu2 %1920  ;;  %v1331_v30 = vsel %vm324_vm1, %v1330_v15, %v1281_v22  ;;  %v1221_v54 = vsel %vm324_vm1, %v1181_v13, %v1220_v59  ;;  %v1218_v42 = vrot.slane %v1181_v13, 4  ;;  %v1318_v60 = vrot.slane %v2879_v45, 4 }
 0x136   :  { %v2859_v37 = vpop.permute.xlu1 %1895  ;;  %v1923_v22 = vunpack.i.h.bf16 %v2881_v49  ;;  %v2902_v31 = vperm.slane %v1331_v30, %v2398_v7  ;;  %v2913_v59 = vperm.slane %v1221_v54, %v2398_v7  ;;  %v3468_v41 = vunpack.i.l.bf16 %v2881_v49 }
 0x137   :  { %v1898_v15 = vunpack.i.h.bf16 %v2859_v37  ;;  %v1219_v54 = vsel %vm324_vm1, %v1218_v42, %v1169_v56 }
 0x138   :  { %v2915_v13 = vrot.slane %v1923_v22, 4  ;;  %v1396_v57 = vrot.slane %v3468_v41, 4 }
 0x139   :  { %v2934_v8 = vrot.slane %v1898_v15, 4 }
 0x142   :  { %v2837_v24 = vpop.permute.xlu0 %1905 }
 0x143   :  { %v1908_v1 = vunpack.i.h.bf16 %v2837_v24  ;;  %v1907_v36 = vunpack.i.l.bf16 %v2837_v24  ;;  %v1206_v24 = vrot.slane %v2876_v10, 4 }
 0x145   :  { %v1048_v26 = vrot.slane %v1908_v1, 4  ;;  %v1047_v4 = vsel %vm324_vm1, %v1046_v58, %v1908_v1  ;;  %v1036_v33 = vrot.slane %v1907_v36, 4  ;;  %v1035_v30 = vsel %vm324_vm1, %v1034_v44, %v1907_v36 }
 0x146   :  { %v2923_v14 = vperm.slane %v1047_v4, %v2300_v61  ;;  %v2944_v56 = vperm.slane %v1035_v30, %v2300_v61  ;;  %v2954_v4 = vperm.slane %v1219_v54, %v2398_v7 }
 0x147   :  { %v1049_v32 = vsel %vm324_vm1, %v1888_v21, %v1048_v26  ;;  %v1037_v19 = vsel %vm324_vm1, %v1873_v48, %v1036_v33  ;;  %v3470_v26 = vunpack.i.l.bf16 %v2859_v37 }
 0x148   :  { %v2941_v42 = vperm.slane %v1049_v32, %v2300_v61  ;;  %v1045_v36 = vperm.slane %v1037_v19, %v2300_v61  ;;  %v2958_v32 = vsel %vm324_vm1, %v1206_v24, %v2853_v20 }
 0x149   :  { %v1360_v21 = vrot.slane %v3470_v26, 4 }
 0x14a   :  { %v2884_v2 = vpop.permute.xlu0 %1910  ;;  %v1108_v25 = vrot.slane %v2941_v42, 4 }
 0x14b   :  { %v3469_v62 = vunpack.i.h.bf16 %v2884_v2 }
 0x14d   :  { %v1260_v41 = vrot.slane %v3469_v62, 4 }
 0x14e   :  { %v1936_v6 = vpop.permute.xlu1 %1935 }
 0x14f   :  { %v1937_v35 = vunpack.i.l.bf16 %v1936_v6  ;;  %v1938_v48 = vunpack.i.h.bf16 %v1936_v6 }
 0x151   :  { %v1025_v1 = vsel %vm324_vm1, %v1937_v35, %v1024_v50  ;;  %v1022_v5 = vrot.slane %v1937_v35, 4  ;;  %v1058_v51 = vrot.slane %v1938_v48, 4 }
 0x152   :  { %v2926_v11 = vpop.permute.xlu0 %1925  ;;  %v1033_v44 = vperm.slane %v1025_v1, %v2300_v61  ;;  %v3471_v1 = vunpack.i.h.bf16 %v2822_v16 }
 0x153   :  { %v3437_v50 = vunpack.i.h.bf16 %v2926_v11  ;;  %v3436_v58 = vunpack.i.l.bf16 %v2926_v11 }
 0x154   :  { %v1261_v6 = vsel %vm324_vm1, %v3471_v1, %v1260_v41  ;;  %v1084_v24 = vrot.slane %v1033_v44, 4  ;;  %v1082_v1 = vrot.slane %v1045_v36, 4 }
 0x155   :  { %v1372_v62 = vrot.slane %v3436_v58, 4  ;;  %v1384_v33 = vrot.slane %v3437_v50, 4  ;;  %v2967_v58 = vsel %vm324_vm1, %v1318_v60, %v2842_v55  ;;  %v3472_v50 = vunpack.i.l.bf16 %v2884_v2 }
 0x156   :  { %v2951_v26 = vpop.permute.xlu1 %1945  ;;  %v1269_v60 = vperm.slane %v1261_v6, %v2300_v61  ;;  %v3473_v55 = vunpack.i.l.bf16 %v2822_v16  ;;  %v3474_v6 = vunpack.i.l.bf16 %v2826_v34 }
 0x157   :  { %v3442_v19 = vunpack.i.h.bf16 %v2951_v26  ;;  %v1148_v54 = vrot.slane %v3472_v50, 4  ;;  %v1373_v17 = vsel %vm324_vm1, %v1898_v15, %v1372_v62  ;;  %v1385_v18 = vsel %vm324_vm1, %v1923_v22, %v1384_v33 }
 0x158   :  { %v1061_v50 = vsel %vm324_vm1, %v1938_v48, %v1060_v27  ;;  %v1381_v35 = vperm.slane %v1373_v17, %v2300_v61  ;;  %v3443_v45 = vunpack.i.l.bf16 %v2951_v26  ;;  %v1023_v22 = vsel %vm324_vm1, %v1022_v5, %v3474_v6 }
 0x159   :  { %v1249_v41 = vsel %vm324_vm1, %v3442_v19, %v2871_v3  ;;  %v1149_v3 = vsel %vm324_vm1, %v3473_v55, %v1148_v54  ;;  %v1085_v48 = vsel %vm324_vm1, %v1045_v36, %v1084_v24  ;;  %v1393_v17 = vperm.slane %v1385_v18, %v2300_v61 }
 0x15a   :  { %v2981_v15 = vpop.permute.xlu0 %1930  ;;  %v1257_v27 = vperm.slane %v1249_v41, %v2300_v61  ;;  %v3475_v33 = vunpack.i.l.bf16 %v2828_v43  ;;  %v1306_v54 = vrot.slane %v1269_v60, 4  ;;  %v1069_v34 = vperm.slane %v1061_v50, %v2300_v61 }
 0x15b   :  { %v3444_v62 = vunpack.i.h.bf16 %v2981_v15  ;;  %v1932_v30 = vunpack.i.l.bf16 %v2981_v15  ;;  %v1418_v36 = vrot.slane %v1381_v35, 4  ;;  %v3007_v18 = vperm.slane %v1023_v22, %v2300_v61 }
 0x15c   :  { %v1059_v19 = vsel %vm324_vm1, %v1058_v51, %v3475_v33  ;;  %v1137_v51 = vsel %vm324_vm1, %v3443_v45, %v2889_v23  ;;  %v3017_v43 = vperm.slane %v1149_v3, %v2300_v61  ;;  %v1308_v50 = vrot.slane %v1257_v27, 4 }
 0x15d   :  { %v1397_v16 = vsel %vm324_vm1, %v3444_v62, %v1396_v57  ;;  %v1361_v55 = vsel %vm324_vm1, %v1932_v30, %v1360_v21  ;;  %v3014_v57 = vperm.slane %v1085_v48, %v2398_v7  ;;  %v3020_v21 = vperm.slane %v1059_v19, %v2300_v61 }
 0x15e   :  { %v1405_v5 = vperm.slane %v1397_v16, %v2300_v61  ;;  %v1369_v41 = vperm.slane %v1361_v55, %v2300_v61  ;;  %v1444_v6 = vrot.slane %v1393_v17, 4  ;;  %v1307_v16 = vsel %vm324_vm1, %v1306_v54, %v1257_v27 }
 0x15f   :  { %v1106_v55 = vrot.slane %v1069_v34, 4  ;;  %v1083_v23 = vsel %vm324_vm1, %v1082_v1, %v1033_v44  ;;  %v3026_v48 = vperm.slane %v1137_v51, %v2300_v61  ;;  %v1109_v3 = vsel %vm324_vm1, %v1069_v34, %v1108_v25 }
 0x160   :  { %v1442_v24 = vrot.slane %v1405_v5, 4  ;;  %v1419_v22 = vsel %vm324_vm1, %v1418_v36, %v1369_v41  ;;  %v1420_v33 = vrot.slane %v1369_v41, 4  ;;  %v1072_v45 = vrot.slane %v3007_v18, 4 }
 0x161   :  { %v1445_v19 = vsel %vm324_vm1, %v1405_v5, %v1444_v6  ;;  %v3032_v62 = vperm.slane %v1109_v3, %v2398_v7  ;;  %v1132_v36 = vrot.slane %v3014_v57, 4  ;;  %v3036_v41 = vperm.slane %v1307_v16, %v2398_v7 }
 0x162   :  { %v3039_v27 = vperm.slane %v1419_v22, %v2398_v7  ;;  %v1443_v44 = vsel %vm324_vm1, %v1442_v24, %v1393_v17  ;;  %v1309_v1 = vsel %vm324_vm1, %v1269_v60, %v1308_v50  ;;  %v1421_v5 = vsel %vm324_vm1, %v1381_v35, %v1420_v33 }
 0x163   :  { %v1133_v25 = vsel %vm324_vm1, %v3032_v62, %v1132_v36  ;;  %v3046_v54 = vperm.slane %v1443_v44, %v2398_v7  ;;  %v3049_v34 = vperm.slane %v1309_v1, %v2398_v7  ;;  %v1196_v51 = vrot.slane %v3026_v48, 4 }
 0x164   :  { %v1984_v6 = vpack.i.bf16 %v2660_v28, %v1133_v25  ;;  %v1352_v22 = vrot.slane %v3036_v41, 4  ;;  %v1464_v17 = vrot.slane %v3039_v27, 4  ;;  %v1358_v60 = vrot.slane %v1932_v30, 4 }
 0x165   :  { %v3057_v24 = vperm.slane %v1421_v5, %v2398_v7  ;;  %v3060_v50 = vperm.slane %v1445_v19, %v2398_v7  ;;  %v1073_v16 = vsel %vm324_vm1, %v2944_v56, %v1072_v45  ;;  %v3476_v30 = vrot.slane %v2923_v14, 4 }
 0x166   :  { %1985 = vrot.lane.b32.xlu0 %v1984_v6, %s2198_s2  ;;  %v1353_v35 = vsel %vm324_vm1, %v2902_v31, %v1352_v22  ;;  %v1465_v28 = vsel %vm324_vm1, %v3046_v54, %v1464_v17  ;;  %v3070_v33 = vperm.slane %v1073_v16, %v2398_v7  ;;  %v3477_v45 = vrot.slane %v2897_v0, 4 }
 0x167   :  { %v1097_v3 = vsel %vm324_vm1, %v3020_v21, %v3476_v30  ;;  %v1964_v19 = vpack.i.bf16 %v1465_v28, %v1353_v35  ;;  %v1466_v44 = vrot.slane %v3060_v50, 4  ;;  %v3082_v1 = vperm.slane %v1083_v23, %v2398_v7 }
 0x168   :  { %v1355_v36 = vsel %vm324_vm1, %v3477_v45, %v3049_v34  ;;  %v3085_v25 = vperm.slane %v1097_v3, %v2398_v7  ;;  %v1124_v5 = vrot.slane %v3070_v33, 4  ;;  %v1107_v6 = vsel %vm324_vm1, %v1106_v55, %v2941_v42 }
 0x169   :  { %v1197_v22 = vsel %vm324_vm1, %v3017_v43, %v1196_v51  ;;  %v3478_v17 = vunpack.i.h.bf16 %v2884_v2  ;;  %v1094_v35 = vrot.slane %v3020_v21, 4  ;;  %1965 = vrot.lane.b32.xlu1 %v1964_v19, %s2202_s9  ;;  %v1467_v23 = vsel %vm324_vm1, %v1466_v44, %v3057_v24 }
 0x16a   :  { %v3101_v28 = vperm.slane %v1107_v6, %v2398_v7  ;;  %v3479_v42 = vunpack.i.h.bf16 %v2951_v26  ;;  %v1969_v30 = vpack.i.bf16 %v1467_v23, %v1355_v36  ;;  %v1125_v51 = vsel %vm324_vm1, %v3085_v25, %v1124_v5 }
 0x16b   :  { %v1259_v16 = vsel %vm324_vm1, %v2846_v40, %v3478_v17  ;;  %v1128_v3 = vrot.slane %v3082_v1, 4  ;;  %v3480_v40 = vunpack.i.h.bf16 %v2981_v15  ;;  %v3481_v19 = vunpack.i.l.bf16 %v2859_v37 }
 0x16c   :  { %v1246_v55 = vrot.slane %v3479_v42, 4  ;;  %v1130_v44 = vrot.slane %v3032_v62, 4  ;;  %v3115_v6 = vperm.slane %v1197_v22, %v2398_v7  ;;  %v3482_v17 = vunpack.i.l.bf16 %v2951_v26  ;;  %1970 = vrot.lane.b32.xlu2 %v1969_v30, %s2201_s3 }
 0x16d   :  { %v1394_v21 = vrot.slane %v3480_v40, 4  ;;  %v1359_v45 = vsel %vm324_vm1, %v1358_v60, %v3481_v19  ;;  %v1999_v5 = vpack.i.bf16 %v2678_v12, %v1125_v51  ;;  %v1129_v15 = vsel %vm324_vm1, %v3101_v28, %v1128_v3 }
 0x16e   :  { %v1134_v36 = vrot.slane %v3482_v17, 4  ;;  %v3483_v37 = vrot.slane %v2944_v56, 4  ;;  %v1244_v62 = vrot.slane %v3115_v6, 4  ;;  %v1095_v26 = vsel %vm324_vm1, %v1094_v35, %v2923_v14 }
 0x16f   :  { %v3135_v23 = vperm.slane %v2958_v32, %v2398_v7  ;;  %v3138_v12 = vperm.slane %v1259_v16, %v2300_v61  ;;  %v3484_v42 = vunpack.i.l.bf16 %v2884_v2  ;;  %v1365_v30 = vperm.slane %v1359_v45, %v2300_v61  ;;  %2000 = vrot.lane.b32.xlu0 %v1999_v5, %s2198_s2 }
 0x170   :  { %v1071_v60 = vsel %vm324_vm1, %v3483_v37, %v3007_v18  ;;  %v1194_v18 = vrot.slane %v3017_v43, 4  ;;  %v3485_v14 = vunpack.i.h.bf16 %v2926_v11  ;;  %v3486_v35 = vunpack.i.l.bf16 %v2881_v49 }
 0x171   :  { %v3129_v22 = vperm.slane %v1071_v60, %v2398_v7  ;;  %v1147_v56 = vsel %vm324_vm1, %v2850_v39, %v3484_v42  ;;  %v1974_v2 = vpack.i.bf16 %v2695_v53, %v1129_v15  ;;  %v1131_v39 = vsel %vm324_vm1, %v1130_v44, %v3014_v57 }
 0x172   :  { %v1383_v32 = vsel %vm324_vm1, %v2915_v13, %v3485_v14  ;;  %v1395_v16 = vsel %vm324_vm1, %v1394_v21, %v3486_v35  ;;  %v3487_v43 = vunpack.i.h.bf16 %v2824_v38  ;;  %v3488_v3 = vunpack.i.l.bf16 %v2824_v38 }
 0x173   :  { %v1101_v19 = vperm.slane %v1095_v26, %v2398_v7  ;;  %v1120_v13 = vrot.slane %v3129_v22, 4  ;;  %v3166_v49 = vperm.slane %v1147_v56, %v2300_v61  ;;  %v3489_v53 = vunpack.i.l.bf16 %v2926_v11  ;;  %1975 = vrot.lane.b32.xlu1 %v1974_v2, %s2202_s9 }
 0x174   :  { %v1247_v51 = vsel %vm324_vm1, %v1246_v55, %v3487_v43  ;;  %v1135_v40 = vsel %vm324_vm1, %v1134_v36, %v3488_v3  ;;  %v1195_v21 = vsel %vm324_vm1, %v1194_v18, %v3026_v48  ;;  %v1245_v38 = vsel %vm324_vm1, %v2913_v59, %v1244_v62 }
 0x175   :  { %v1371_v57 = vsel %vm324_vm1, %v2934_v8, %v3489_v53  ;;  %v1401_v55 = vperm.slane %v1395_v16, %v2300_v61  ;;  %v1408_v45 = vrot.slane %v1365_v30, 4  ;;  %v1979_v44 = vpack.i.bf16 %v2698_v9, %v1131_v39 }
 0x176   :  { %v3181_v17 = vperm.slane %v2967_v58, %v2398_v7  ;;  %v1389_v11 = vperm.slane %v1383_v32, %v2300_v61  ;;  %v1253_v8 = vperm.slane %v1247_v51, %v2300_v61  ;;  %v1141_v48 = vperm.slane %v1135_v40, %v2300_v61 }
 0x177   :  { %v1122_v36 = vrot.slane %v3085_v25, 4  ;;  %v1377_v5 = vperm.slane %v1371_v57, %v2300_v61  ;;  %1980 = vrot.lane.b32.xlu2 %v1979_v44, %s2201_s3  ;;  %v2024_v15 = vpack.i.bf16 %v2701_v46, %v1245_v38  ;;  %v1121_v9 = vsel %vm324_vm1, %v1101_v19, %v1120_v13 }
 0x178   :  { %v1201_v37 = vperm.slane %v1195_v21, %v2398_v7  ;;  %v1294_v58 = vrot.slane %v3138_v12, 4  ;;  %v1182_v60 = vrot.slane %v3166_v49, 4  ;;  %v1242_v62 = vrot.slane %v2913_v59, 4 }
 0x179   :  { %v3490_v26 = vrot.slane %v2853_v20, 4  ;;  %v1430_v61 = vrot.slane %v1401_v55, 4  ;;  %2025 = vrot.lane.b32.xlu0 %v2024_v15, %s2198_s2  ;;  %v1238_v46 = vrot.slane %v2954_v4, 4  ;;  %v1409_v42 = vsel %vm324_vm1, %v1377_v5, %v1408_v45 }
 0x17a   :  { %v1230_v56 = vrot.slane %v3135_v23, 4  ;;  %v1989_v18 = vpack.i.bf16 %v2730_v52, %v1121_v9  ;;  %v1123_v14 = vsel %vm324_vm1, %v1122_v36, %v3070_v33  ;;  %v1183_v59 = vsel %vm324_vm1, %v1182_v60, %v1141_v48 }
 0x17b   :  { %v1209_v25 = vsel %vm324_vm1, %v2876_v10, %v3490_v26  ;;  %v1295_v20 = vsel %vm324_vm1, %v1294_v58, %v1253_v8  ;;  %v1432_v32 = vrot.slane %v1389_v11, 4  ;;  %v1462_v10 = vrot.slane %v3046_v54, 4 }
 0x17c   :  { %v1240_v35 = vrot.slane %v1201_v37, 4  ;;  %v1342_v16 = vrot.slane %v3181_v17, 4  ;;  %v1406_v2 = vrot.slane %v1377_v5, 4  ;;  %v1126_v39 = vrot.slane %v3101_v28, 4  ;;  %1990 = vrot.lane.b32.xlu1 %v1989_v18, %s2202_s9 }
 0x17d   :  { %v1118_v43 = vrot.slane %v1101_v19, 4  ;;  %v3213_v52 = vperm.slane %v1409_v42, %v2398_v7  ;;  %v1994_v33 = vpack.i.bf16 %v2720_v29, %v1123_v14  ;;  %v1189_v51 = vperm.slane %v1183_v59, %v2398_v7 }
 0x17e   :  { %v1301_v3 = vperm.slane %v1295_v20, %v2398_v7  ;;  %v1431_v54 = vsel %vm324_vm1, %v1430_v61, %v1389_v11  ;;  %v1296_v40 = vrot.slane %v1253_v8, 4  ;;  %v1184_v13 = vrot.slane %v1141_v48, 4  ;;  %v3497_v61 = vld [vmem:[#allocation16_spill] sm:$0xff] }
 0x17f   :  { %v1433_v53 = vsel %vm324_vm1, %v1401_v55, %v1432_v32  ;;  %v3221_v28 = vperm.slane %v1431_v54, %v2398_v7  ;;  %1995 = vrot.lane.b32.xlu2 %v1994_v33, %s2201_s3  ;;  %v1241_v19 = vsel %vm324_vm1, %v2954_v4, %v1240_v35  ;;  %v1407_v29 = vsel %vm324_vm1, %v1406_v2, %v1365_v30  ;;  %v3495_v30 = vld [vmem:[#allocation31_spill] sm:$0xff] }
 0x180   :  { %v3229_v57 = vsel %vm324_vm1, %v1462_v10, %v3039_v27  ;;  %v3491_v21 = vrot.slane %v2902_v31, 4  ;;  %v1460_v55 = vrot.slane %v3213_v52, 4  ;;  %v3241_v44 = vsel %vm324_vm1, %v1126_v39, %v3082_v1  ;;  %v3493_v31 = vld [vmem:[#allocation30_spill] sm:$0xff] }
 0x181   :  { %v1454_v45 = vrot.slane %v3221_v28, 4  ;;  %v3245_v4 = vsel %vm324_vm1, %v1118_v43, %v3129_v22  ;;  %v3492_v27 = vpack.i.bf16 %v2746_v63, %v2739_v47  ;;  %v3256_v8 = vsel %vm324_vm1, %v1238_v46, %v1201_v37  ;;  %v3496_v22 = vld [vmem:[#allocation15_spill] sm:$0xff] }
 0x182   :  { %v3235_v38 = vsel %vm324_vm1, %v3491_v21, %v3036_v41  ;;  %v3494_v41 = vrot.slane %v3493_v31, 4  ;;  %v3259_v1 = vsel %vm324_vm1, %v1342_v16, %v1301_v3  ;;  %v3262_v48 = vsel %vm324_vm1, %v1230_v56, %v1189_v51 }
 0x183   :  { %2045 = vrot.lane.b32.xlu0 %v3492_v27, %s2198_s2  ;;  %v2004_v36 = vpack.i.bf16 %v3496_v22, %v1241_v19  ;;  %v1243_v47 = vsel %vm324_vm1, %v1242_v62, %v3115_v6  ;;  %v1441_v63 = vperm.slane %v1433_v53, %v2398_v7  ;;  %v1413_v5 = vperm.slane %v1407_v29, %v2398_v7 }
 0x184   :  { %v1321_v11 = vsel %vm324_vm1, %v3495_v30, %v3494_v41  ;;  %v1232_v15 = vrot.slane %v1189_v51, 4  ;;  %v1344_v9 = vrot.slane %v1301_v3, 4  ;;  %v1185_v37 = vsel %vm324_vm1, %v3166_v49, %v1184_v13  ;;  %v3499_v51 = vld [vmem:[#allocation19_spill] sm:$0xff]  ;;  %v3500_v3 = vld [vmem:[#allocation18_spill] sm:$0xff] }
 0x185   :  { %v1297_v58 = vsel %vm324_vm1, %v3138_v12, %v1296_v40  ;;  %2005 = vrot.lane.b32.xlu1 %v2004_v36, %s2202_s9  ;;  %v1461_v60 = vsel %vm324_vm1, %v1441_v63, %v1460_v55  ;;  %v1217_v26 = vperm.slane %v1209_v25, %v2398_v7  ;;  %v1329_v6 = vperm.slane %v1321_v11, %v2398_v7  ;;  %v3498_v12 = vld [vmem:[#allocation17_spill] sm:$0xff]  ;;  %v3503_v55 = vld [vmem:[#allocation26_spill] sm:$0xff] }
 0x186   :  { %v3278_v62 = vsel %vm324_vm1, %v1454_v45, %v1413_v5  ;;  %v2009_v46 = vpack.i.bf16 %v3497_v61, %v1243_v47  ;;  %v1193_v42 = vperm.slane %v1185_v37, %v2398_v7  ;;  %v1305_v49 = vperm.slane %v1297_v58, %v2398_v7 }
 0x187   :  { %v2059_v56 = vpack.i.bf16 %v3498_v12, %v1461_v60  ;;  %v1233_v18 = vsel %vm324_vm1, %v3135_v23, %v1232_v15  ;;  %v1345_v25 = vsel %vm324_vm1, %v3181_v17, %v1344_v9  ;;  %v1234_v14 = vrot.slane %v1217_v26, 4  ;;  %v3504_v9 = vld [vmem:[#allocation20_spill] sm:$0xff] }
 0x188   :  { %2010 = vrot.lane.b32.xlu2 %v2009_v46, %s2201_s3  ;;  %v1346_v59 = vrot.slane %v1329_v6, 4  ;;  %v2014_v20 = vpack.i.bf16 %v1345_v25, %v1233_v18  ;;  %v1236_v7 = vrot.slane %v1193_v42, 4  ;;  %v1348_v35 = vrot.slane %v1305_v49, 4 }
 0x189   :  { %v1235_v32 = vsel %vm324_vm1, %v1234_v14, %v1193_v42  ;;  %v1356_v39 = vrot.slane %v3049_v34, 4  ;;  %v1468_v43 = vrot.slane %v3057_v24, 4  ;;  %v1458_v33 = vrot.slane %v1441_v63, 4  ;;  %v3502_v24 = vld [vmem:[#allocation21_spill] sm:$0xff] }
 0x18a   :  { %v1347_v10 = vsel %vm324_vm1, %v1346_v59, %v1305_v49  ;;  %v1237_v23 = vsel %vm324_vm1, %v1217_v26, %v1236_v7  ;;  %v1349_v17 = vsel %vm324_vm1, %v1329_v6, %v1348_v35  ;;  %v3501_v54 = vpack.i.bf16 %v3499_v51, %v3500_v3 }
 0x18b   :  { %2060 = vrot.lane.b32.xlu0 %v2059_v56, %s2198_s2  ;;  %v2019_v16 = vpack.i.bf16 %v1347_v10, %v1235_v32  ;;  %v2029_v2 = vpack.i.bf16 %v1349_v17, %v1237_v23  ;;  %v1357_v40 = vsel %vm324_vm1, %v2897_v0, %v1356_v39  ;;  %v1469_v13 = vsel %vm324_vm1, %v3060_v50, %v1468_v43  ;;  %v3316_v0 = vpop.permute.xlu0 %1940  ;;  %v3318_v50 = vpop.permute.xlu2 %1955  ;;  %v3336_v56 = vld [vmem:[#allocation5] sm:$0xff] }
 0x18c   :  { %v2034_v53 = vpack.i.bf16 %v1469_v13, %v1357_v40  ;;  %v1459_v34 = vsel %vm324_vm1, %v1458_v33, %v3213_v52  ;;  %v1456_v19 = vrot.slane %v1413_v5, 4  ;;  %v3506_v40 = vld [vmem:[#allocation23_spill] sm:$0xff] }
 0x18d   :  { %2015 = vrot.lane.b32.xlu1 %v2014_v20, %s2202_s9  ;;  %v2054_v29 = vpack.i.bf16 %v3502_v24, %v1459_v34  ;;  %v3505_v20 = vld [vmem:[#allocation22_spill] sm:$0xff] }
 0x18e   :  { %v1457_v21 = vsel %vm324_vm1, %v3221_v28, %v1456_v19 }
 0x18f   :  { %v2049_v45 = vpack.i.bf16 %v3503_v55, %v1457_v21 }
 0x190   :  { %2020 = vrot.lane.b32.xlu2 %v2019_v16, %s2201_s3 }
 0x193   :  { %v3320_v27 = vpop.permute.xlu0 %1950 }
 0x195   :  { %2030 = vrot.lane.b32.xlu1 %v2029_v2, %s2198_s2 }
 0x198   :  { %2040 = vrot.lane.b32.xlu2 %v3501_v54, %s2201_s3 }
 0x19b   :  { %v3324_v31 = vpop.permute.xlu0 %1960 }
 0x19d   :  { %2035 = vrot.lane.b32.xlu1 %v2034_v53, %s2198_s2 }
 0x1a0   :  { %2055 = vrot.lane.b32.xlu2 %v2054_v29, %s2201_s3 }
 0x1a5   :  { %2050 = vrot.lane.b32.xlu1 %v2049_v45, %s2202_s9 }
 0x1c6   :  { %v3322_v52 = vpop.permute.xlu2 %1970 }
 0x1d1   :  { %v1981_v30 = vpop.permute.xlu2 %1980 }
 0x1d2   :  { %v1983_v47 = vunpack.i.h.bf16 %v1981_v30  ;;  %v1982_v63 = vunpack.i.l.bf16 %v1981_v30  ;;  %v1953_v30 = vunpack.i.h.bf16 %v3320_v27 }
 0x1d8   :  { %v1986_v11 = vpop.permute.xlu0 %1985 }
 0x1d9   :  { %v1987_v5 = vunpack.i.l.bf16 %v1986_v11  ;;  %v1996_v26 = vpop.permute.xlu2 %1995  ;;  %v1988_v6 = vunpack.i.h.bf16 %v1986_v11  ;;  %v1952_v11 = vunpack.i.l.bf16 %v3320_v27 }
 0x1da   :  { %v1998_v18 = vunpack.i.h.bf16 %v1996_v26  ;;  %v1997_v25 = vunpack.i.l.bf16 %v1996_v26  ;;  %v3508_v26 = vld [vmem:[#allocation25_spill] sm:$0xff] }
 0x1db   :  { %v3326_v41 = vpop.permute.xlu1 %1965  ;;  %v882_v27 = vsel %vm113_vm0, %v3508_v26, %v1953_v30  ;;  %v3511_v30 = vld [vmem:[#allocation29_spill] sm:$0xff] }
 0x1e1   :  { %v2001_v46 = vpop.permute.xlu0 %2000 }
 0x1e2   :  { %v2002_v14 = vunpack.i.l.bf16 %v2001_v46  ;;  %v2003_v35 = vunpack.i.h.bf16 %v2001_v46  ;;  %v2011_v23 = vpop.permute.xlu2 %2010  ;;  %v1967_v46 = vunpack.i.l.bf16 %v3326_v41 }
 0x1e3   :  { %v2012_v51 = vunpack.i.l.bf16 %v2011_v23 }
 0x1e5   :  { %v1976_v22 = vpop.permute.xlu1 %1975 }
 0x1e6   :  { %v1978_v28 = vunpack.i.h.bf16 %v1976_v22  ;;  %v1977_v36 = vunpack.i.l.bf16 %v1976_v22 }
 0x1e8   :  { %v1569_v15 = vsel %vm113_vm0, %v3241_v44, %v1977_v36  ;;  %v873_v37 = vsel %vm113_vm0, %v3504_v9, %v1978_v28  ;;  %v1963_v36 = vunpack.i.h.bf16 %v3324_v31 }
 0x1e9   :  { %v1570_v58 = vsel %vm869_vm2, %v1569_v15, %v1982_v63  ;;  %v874_v60 = vsel %vm869_vm2, %v873_v37, %v1983_v47  ;;  %v1962_v47 = vunpack.i.l.bf16 %v3324_v31  ;;  %v1968_v31 = vunpack.i.h.bf16 %v3326_v41 }
 0x1ea   :  { %v1571_v61 = vsel %vm871_vm3, %v1570_v58, %v1987_v5  ;;  %v875_v42 = vsel %vm871_vm3, %v874_v60, %v1988_v6  ;;  %v2021_v55 = vpop.permute.xlu2 %2020  ;;  %v3507_v58 = vld [vmem:[#allocation24_spill] sm:$0xff]  ;;  %v1957_v6 = vunpack.i.l.bf16 %v3318_v50 }
 0x1eb   :  { %1647 = vmatpush.msrb.mxu2 %v1571_v61  ;;  %v2026_v2 = vpop.permute.xlu0 %2025  ;;  %v2023_v63 = vunpack.i.h.bf16 %v2021_v55  ;;  %v2022_v5 = vunpack.i.l.bf16 %v2021_v55  ;;  %v876_v60 = vsel %vm113_vm0, %v3507_v58, %v1952_v11 }
 0x1ec   :  { %v2027_v3 = vunpack.i.l.bf16 %v2026_v2  ;;  %v2028_v19 = vunpack.i.h.bf16 %v2026_v2  ;;  %v3510_v2 = vld [vmem:[#allocation28_spill] sm:$0xff] }
 0x1ed   :  { %1648 = vmatpush.msrb.mxu2 %v875_v42 }
 0x1ee   :  { %v1991_v49 = vpop.permute.xlu1 %1990  ;;  %1833 = vmatmul.msk.f32.vlgmr.msrb.gmra.mxu2 %vm1609_vm4, %v3336_v56 }
 0x1ef   :  { %v1993_v12 = vunpack.i.h.bf16 %v1991_v49  ;;  %v1992_v44 = vunpack.i.l.bf16 %v1991_v49 }
 0x1f1   :  { %v1566_v59 = vsel %vm113_vm0, %v3245_v4, %v1992_v44  ;;  %v868_v32 = vsel %vm113_vm0, %v3505_v20, %v1993_v12  ;;  %v2013_v4 = vunpack.i.h.bf16 %v2011_v23  ;;  %v1943_v44 = vunpack.i.h.bf16 %v3316_v0  ;;  %v3509_v23 = vld [vmem:[#allocation27_spill] sm:$0xff] }
 0x1f2   :  { %v1567_v10 = vsel %vm869_vm2, %v1566_v59, %v1997_v25  ;;  %v870_v7 = vsel %vm869_vm2, %v868_v32, %v1998_v18  ;;  %v2041_v42 = vpop.permute.xlu2 %2040  ;;  %v1942_v18 = vunpack.i.l.bf16 %v3316_v0  ;;  %v1581_v0 = vsel %vm113_vm0, %v3235_v38, %v1967_v46 }
 0x1f3   :  { %v1568_v16 = vsel %vm871_vm3, %v1567_v10, %v2002_v14  ;;  %v872_v17 = vsel %vm871_vm3, %v870_v7, %v2003_v35  ;;  %v2043_v41 = vunpack.i.h.bf16 %v2041_v42  ;;  %v2042_v20 = vunpack.i.l.bf16 %v2041_v42 }
 0x1f4   :  { %1627 = vmatpush.msrb.mxu1 %v1568_v16  ;;  %v1587_v10 = vsel %vm113_vm0, %v3229_v57, %v1968_v31  ;;  %v1973_v7 = vunpack.i.h.bf16 %v3322_v52  ;;  %v1972_v35 = vunpack.i.l.bf16 %v3322_v52  ;;  %v891_v57 = vsel %vm113_vm0, %v3510_v2, %v1943_v44 }
 0x1f5   :  { %v2046_v32 = vpop.permute.xlu0 %2045 }
 0x1f6   :  { %1628 = vmatpush.msrb.mxu1 %v872_v17  ;;  %v885_v17 = vsel %vm113_vm0, %v3509_v23, %v1942_v18 }
 0x1f7   :  { %v2006_v39 = vpop.permute.xlu1 %2005  ;;  %1832 = vmatmul.msk.f32.vlgmr.msrb.gmra.mxu1 %vm1609_vm4, %v3336_v56 }
 0x1f8   :  { %v2008_v43 = vunpack.i.h.bf16 %v2006_v39  ;;  %v2007_v33 = vunpack.i.l.bf16 %v2006_v39  ;;  %v2048_v39 = vunpack.i.h.bf16 %v2046_v32 }
 0x1fa   :  { %v1575_v54 = vsel %vm113_vm0, %v3256_v8, %v2007_v33  ;;  %v879_v13 = vsel %vm113_vm0, %v3506_v40, %v2008_v43  ;;  %v2047_v43 = vunpack.i.l.bf16 %v2046_v32 }
 0x1fb   :  { %v1576_v53 = vsel %vm869_vm2, %v1575_v54, %v2012_v51  ;;  %v880_v34 = vsel %vm869_vm2, %v879_v13, %v2013_v4  ;;  %v1582_v4 = vsel %vm869_vm2, %v1581_v0, %v1972_v35  ;;  %v1588_v51 = vsel %vm869_vm2, %v1587_v10, %v1973_v7 }
 0x1fc   :  { %v1577_v24 = vsel %vm871_vm3, %v1576_v53, %v2027_v3  ;;  %v881_v29 = vsel %vm871_vm3, %v880_v34, %v2028_v19  ;;  %v886_v3 = vsel %vm869_vm2, %v885_v17, %v2042_v20  ;;  %v892_v54 = vsel %vm869_vm2, %v891_v57, %v2043_v41  ;;  %v2056_v34 = vpop.permute.xlu2 %2055 }
 0x1fd   :  { %1687 = vmatpush.msra.mxu1 %v1577_v24  ;;  %v887_v13 = vsel %vm871_vm3, %v886_v3, %v2047_v43  ;;  %v893_v53 = vsel %vm871_vm3, %v892_v54, %v2048_v39  ;;  %v2061_v19 = vpop.permute.xlu0 %2060  ;;  %v2058_v55 = vunpack.i.h.bf16 %v2056_v34 }
 0x1ff   :  { %v2016_v21 = vpop.permute.xlu1 %2015  ;;  %1688 = vmatpush.msra.mxu1 %v881_v29 }
 0x200   :  { %1835 = vmatmul.msk.f32.vlgmr.msra.gmra.mxu1 %vm1609_vm4, %v3336_v56  ;;  %v2018_v8 = vunpack.i.h.bf16 %v2016_v21  ;;  %v2017_v45 = vunpack.i.l.bf16 %v2016_v21 }
 0x202   :  { %v1578_v22 = vsel %vm113_vm0, %v3259_v1, %v2018_v8  ;;  %v1572_v28 = vsel %vm113_vm0, %v3262_v48, %v2017_v45  ;;  %v1958_v1 = vunpack.i.h.bf16 %v3318_v50  ;;  %v877_v50 = vsel %vm869_vm2, %v876_v60, %v1957_v6 }
 0x203   :  { %v1573_v48 = vsel %vm869_vm2, %v1572_v28, %v2022_v5  ;;  %v1579_v61 = vsel %vm869_vm2, %v1578_v22, %v2023_v63  ;;  %v878_v14 = vsel %vm871_vm3, %v877_v50, %v1962_v47  ;;  %v2057_v8 = vunpack.i.l.bf16 %v2056_v34 }
 0x204   :  { %v883_v25 = vsel %vm869_vm2, %v882_v27, %v1958_v1  ;;  %v2062_v45 = vunpack.i.l.bf16 %v2061_v19  ;;  %v2063_v47 = vunpack.i.h.bf16 %v2061_v19 }
 0x205   :  { %v884_v59 = vsel %vm871_vm3, %v883_v25, %v1963_v36 }
 0x207   :  { %v2031_v15 = vpop.permute.xlu1 %2030 }
 0x208   :  { %v2033_v9 = vunpack.i.h.bf16 %v2031_v15  ;;  %v2032_v37 = vunpack.i.l.bf16 %v2031_v15  ;;  %v1591_v15 = vld [vmem:[#allocation8] sm:$0xff] }
 0x209   :  { %v1596_v27 = vperm.slane %v1591_v15, 3  ;;  %v1599_v25 = vperm.slane %v1591_v15, 6 }
 0x20a   :  { %v1574_v49 = vsel %vm871_vm3, %v1573_v48, %v2032_v37  ;;  %v1580_v12 = vsel %vm871_vm3, %v1579_v61, %v2033_v9  ;;  %v1594_v9 = vperm.slane %v1591_v15, 1  ;;  %v1593_v37 = vperm.slane %v1591_v15, 0 }
 0x20b   :  { %1667 = vmatpush.msrb.mxu3 %v1574_v49  ;;  %1707 = vmatpush.msra.mxu2 %v1580_v12  ;;  %v1595_v48 = vperm.slane %v1591_v15, 2  ;;  %v1597_v61 = vperm.slane %v1591_v15, 4  ;;  %v1600_v12 = vperm.slane %v1591_v15, 7 }
 0x20d   :  { %1668 = vmatpush.msrb.mxu3 %v878_v14  ;;  %1708 = vmatpush.msra.mxu2 %v884_v59 }
 0x20e   :  { %1834 = vmatmul.msk.f32.vlgmr.msrb.gmra.mxu3 %vm1609_vm4, %v3336_v56  ;;  %1836 = vmatmul.msk.f32.vlgmr.msra.gmra.mxu2 %vm1609_vm4, %v3336_v56 }
 0x20f   :  { %v2036_v16 = vpop.permute.xlu1 %2035 }
 0x210   :  { %v2038_v38 = vunpack.i.h.bf16 %v2036_v16  ;;  %v2037_v33 = vunpack.i.l.bf16 %v2036_v16 }
 0x212   :  { %v1583_v52 = vsel %vm871_vm3, %v1582_v4, %v2037_v33  ;;  %v1589_v40 = vsel %vm871_vm3, %v1588_v51, %v2038_v38 }
 0x213   :  { %1727 = vmatpush.msra.mxu3 %v1583_v52  ;;  %1767 = vmatpush.msrb.mxu2 %v1589_v40 }
 0x215   :  { %1728 = vmatpush.msra.mxu3 %v887_v13  ;;  %1768 = vmatpush.msrb.mxu2 %v893_v53 }
 0x216   :  { %1837 = vmatmul.msk.f32.vlgmr.msra.gmra.mxu3 %vm1609_vm4, %v3336_v56  ;;  %1839 = vmatmul.msk.f32.vlgmr.msrb.gmra.mxu2 %vm1609_vm4, %v3336_v56 }
 0x217   :  { %v2051_v24 = vpop.permute.xlu1 %2050 }
 0x218   :  { %v2053_v29 = vunpack.i.h.bf16 %v2051_v24  ;;  %v2052_v21 = vunpack.i.l.bf16 %v2051_v24 }
 0x21a   :  { %v888_v11 = vsel %vm113_vm0, %v3511_v30, %v2053_v29  ;;  %v1584_v22 = vsel %vm113_vm0, %v3278_v62, %v2052_v21 }
 0x21b   :  { %v1585_v28 = vsel %vm869_vm2, %v1584_v22, %v2057_v8  ;;  %v889_v36 = vsel %vm869_vm2, %v888_v11, %v2058_v55 }
 0x21c   :  { %v1586_v63 = vsel %vm871_vm3, %v1585_v28, %v2062_v45  ;;  %v890_v5 = vsel %vm871_vm3, %v889_v36, %v2063_v47 }
 0x21d   :  { %1747 = vmatpush.msrb.mxu1 %v1586_v63 }
 0x21f   :  { %1748 = vmatpush.msrb.mxu1 %v890_v5 }
 0x220   :  { %1838 = vmatmul.msk.f32.vlgmr.msrb.gmra.mxu1 %vm1609_vm4, %v3336_v56  ;;  %v1598_v56 = vperm.slane %v1591_v15, 5 }
 0x271   :  { %v1650_v58 = vpop.f32.mrf.mxu2 }
 0x272   :  { %v1651_v62 = vadd.f32 %v1650_v58, %v1594_v9 }
 0x274   :  { %v1630_v60 = vpop.f32.mrf.mxu1  ;;  %1774 = vst [vmem:[#allocation10 + $0x8] sm:$0xff] %v1651_v62 }
 0x275   :  { %v1631_v26 = vadd.f32 %v1630_v60, %v1593_v37 }
 0x277   :  { %1773 = vst [vmem:[#allocation10] sm:$0xff] %v1631_v26 }
 0x27d   :  { %v1690_v1 = vpop.f32.mrf.mxu1 }
 0x27e   :  { %v1691_v6 = vadd.f32 %v1690_v1, %v1596_v27 }
 0x280   :  { %1776 = vst [vmem:[#allocation10 + $0x18] sm:$0xff] %v1691_v6 }
 0x291   :  { %v1670_v31 = vpop.f32.mrf.mxu3  ;;  %v1710_v46 = vpop.f32.mrf.mxu2 }
 0x292   :  { %v1671_v42 = vadd.f32 %v1670_v31, %v1595_v48  ;;  %v1711_v49 = vadd.f32 %v1710_v46, %v1597_v61 }
 0x294   :  { %1775 = vst [vmem:[#allocation10 + $0x10] sm:$0xff] %v1671_v42 }
 0x295   :  { %1777 = vst [vmem:[#allocation10 + $0x20] sm:$0xff] %v1711_v49 }
 0x299   :  { %v1730_v44 = vpop.f32.mrf.mxu3  ;;  %v1770_v18 = vpop.f32.mrf.mxu2 }
 0x29a   :  { %v1731_v50 = vadd.f32 %v1730_v44, %v1598_v56  ;;  %v1771_v14 = vadd.f32 %v1770_v18, %v1600_v12 }
 0x29c   :  { %1778 = vst [vmem:[#allocation10 + $0x28] sm:$0xff] %v1731_v50 }
 0x29d   :  { %v1750_v59 = vpop.f32.mrf.mxu1  ;;  %1780 = vst [vmem:[#allocation10 + $0x38] sm:$0xff] %v1771_v14 }
 0x29e   :  { %v1751_v41 = vadd.f32 %v1750_v59, %v1599_v25 }
 0x2a0   :  { %1779 = vst [vmem:[#allocation10 + $0x30] sm:$0xff] %v1751_v41 }
 0x2a1   :  { %1791 = dma.vmem_to_hbm [thread:$0]  %s1787_s11, 1024, %s1789_s14, [#allocation4]  }
 0x2a2   :  { %2190 = dma.done.wait [#allocation4], 1024  }
 0x2a3   :  { %2191 = vsyncadd [#allocation4], 4294966272 }
 0x2a4   :  { %1796 = vsyncpa [#allocation3], 1 }
 0x2a5   :  { %1797 = vsyncpa [#allocation6], 1 }
 0x2a6   :  { %1798 = vsyncpa [#allocation9], 1 }
 0x2a7   :  { %1799 = vsyncpa [#allocation4], 1 }

</bundles_post_ra>
